<compile_context>
chip_gen: v5e
topology: v5e:2x2
jax: 0.10.0
libtpu: 0.0.40
codegen_flags: <defaults>
</compile_context>

<pallas_src>
import jax
import jax.numpy as jnp
from jax.experimental import pallas as pl
from jax.experimental.pallas import tpu as pltpu

IN_FEATURES = 28 * 28      # 784
K_PAD = 896                # 784 padded up to a multiple of 128
H1 = 512
H2 = 128
N_PAD = 128                # num_classes (10) padded to a lane-dense 128
NUM_CLASSES = 10


def mlp_kernel(x_ref, w1_ref, b1_ref, w2_ref, b2_ref, w3_ref, b3_ref, o_ref):
    # x/weights are bf16 -> MXU bf16 path with f32 accumulation; bias/ReLU in f32.
    h1 = jnp.dot(x_ref[...], w1_ref[...], preferred_element_type=jnp.float32)
    h1 = jnp.maximum(h1 + b1_ref[...], 0.0)

    h2 = jnp.dot(h1.astype(jnp.bfloat16), w2_ref[...],
                 preferred_element_type=jnp.float32)
    h2 = jnp.maximum(h2 + b2_ref[...], 0.0)

    h3 = jnp.dot(h2.astype(jnp.bfloat16), w3_ref[...],
                 preferred_element_type=jnp.float32)
    # The PyTorch module applies ReLU to the final logits as well.
    o_ref[...] = jnp.maximum(h3 + b3_ref[...], 0.0)


def neural_network_forward(x, params, *, batch_tile=128, num_classes=NUM_CLASSES):
    """x: (B, 28, 28) float32 -> logits (B, num_classes) float32."""
    w1, b1, w2, b2, w3, b3 = params  # already padded / bf16 (see init_params)
    B = x.shape[0]

    x_flat = x.reshape(B, -1).astype(jnp.bfloat16)

    # Pick a batch tile: multiple of 8 sublanes, at most `batch_tile` rows.
    b_min = pl.cdiv(B, 8) * 8
    tb = min(batch_tile, b_min)
    b_pad = pl.cdiv(B, tb) * tb

    # Zero-pad features 784 -> 896 and batch B -> b_pad (zeros are harmless).
    x_p = jnp.zeros((b_pad, K_PAD), jnp.bfloat16).at[:B, :IN_FEATURES].set(x_flat)

    grid = (b_pad // tb,)

    # Resident (constant-index) specs for weights/biases; tiled specs for x/out.
    const2d = lambda i: (0, 0)
    in_specs = [
        pl.BlockSpec((tb, K_PAD), lambda i: (i, 0)),     # x tile
        pl.BlockSpec((K_PAD, H1), const2d),              # w1 (resident)
        pl.BlockSpec((1, H1), const2d),                  # b1
        pl.BlockSpec((H1, H2), const2d),                 # w2
        pl.BlockSpec((1, H2), const2d),                  # b2
        pl.BlockSpec((H2, N_PAD), const2d),              # w3 (N padded to 128)
        pl.BlockSpec((1, N_PAD), const2d),               # b3
    ]
    out_spec = pl.BlockSpec((tb, N_PAD), lambda i: (i, 0))

    weight_bytes = (w1.size + w2.size + w3.size) * 2 + (b1.size + b2.size + b3.size) * 4
    cost = pl.CostEstimate(
        flops=2 * b_pad * (K_PAD * H1 + H1 * H2 + H2 * N_PAD),
        transcendentals=0,
        bytes_accessed=weight_bytes + x_p.size * 2 + b_pad * N_PAD * 4,
    )

    out = pl.pallas_call(
        mlp_kernel,
        out_shape=jax.ShapeDtypeStruct((b_pad, N_PAD), jnp.float32),
        grid=grid,
        in_specs=in_specs,
        out_specs=out_spec,
        compiler_params=pltpu.CompilerParams(
            dimension_semantics=("parallel",)),
        cost_estimate=cost,
    )(x_p, w1, b1, w2, b2, w3, b3)

    return out[:B, :num_classes]


def init_params(key, input_size=IN_FEATURES, hidden1=H1, hidden2=H2,
                num_classes=NUM_CLASSES):
    """torch.nn.Linear-style init (uniform +/- 1/sqrt(fan_in)).
    Weights stored transposed (in_features, out_features), zero-padded to
    K_PAD / N_PAD, and cast to bf16; biases stay f32 (padded for the last layer)."""
    ks = jax.random.split(key, 6)

    def lin(kw, kb, fan_in, fan_out):
        bound = 1.0 / jnp.sqrt(fan_in)
        w = jax.random.uniform(kw, (fan_in, fan_out), jnp.float32, -bound, bound)
        b = jax.random.uniform(kb, (1, fan_out), jnp.float32, -bound, bound)
        return w, b

    w1, b1 = lin(ks[0], ks[1], input_size, hidden1)
    w2, b2 = lin(ks[2], ks[3], hidden1, hidden2)
    w3, b3 = lin(ks[4], ks[5], hidden2, num_classes)

    # Pad K (rows of w1) 784 -> 896 and N (cols of w3 / b3) 10 -> 128 with zeros.
    w1p = jnp.zeros((K_PAD, hidden1), jnp.float32).at[:input_size].set(w1)
    w3p = jnp.zeros((hidden2, N_PAD), jnp.float32).at[:, :num_classes].set(w3)
    b3p = jnp.zeros((1, N_PAD), jnp.float32).at[:, :num_classes].set(b3)

    return (w1p.astype(jnp.bfloat16), b1,
            w2.astype(jnp.bfloat16), b2,
            w3p.astype(jnp.bfloat16), b3p)


def reference_forward(x, params, num_classes=NUM_CLASSES):
    """Pure-JAX reference using the same (bf16, padded) params as the kernel."""
    w1, b1, w2, b2, w3, b3 = params
    B = x.shape[0]
    h = x.reshape(B, -1).astype(jnp.bfloat16)
    h = jnp.pad(h, ((0, 0), (0, K_PAD - IN_FEATURES)))
    h = jnp.maximum(jnp.dot(h, w1, preferred_element_type=jnp.float32) + b1, 0.0)
    h = jnp.maximum(jnp.dot(h.astype(jnp.bfloat16), w2,
                            preferred_element_type=jnp.float32) + b2, 0.0)
    h = jnp.maximum(jnp.dot(h.astype(jnp.bfloat16), w3,
                            preferred_element_type=jnp.float32) + b3, 0.0)
    return h[:, :num_classes]


if __name__ == "__main__":
    key = jax.random.PRNGKey(0)
    k_param, k_x = jax.random.split(key)

    params = init_params(k_param)
    # matches `x = torch.rand(1, 28, 28)` but with batch=2 for a less degenerate tile
    x = jax.random.uniform(k_x, (2, 28, 28), jnp.float32)

    logits = neural_network_forward(x, params)
    jax.block_until_ready(logits)

    ref = reference_forward(x, params)
    assert logits.shape == (2, NUM_CLASSES)
    assert jnp.allclose(logits, ref, atol=1e-2, rtol=1e-2), (
        jnp.max(jnp.abs(logits - ref)))

    print("KERNEL_OK")
</pallas_src>

<mosaic_0001>
module attributes {stable_mosaic.version = 11 : i64} {
  func.func @mlp_kernel(%arg0: i32, %arg1: memref<8x896xbf16, #tpu.memory_space<vmem>>, %arg2: memref<896x512xbf16, #tpu.memory_space<vmem>>, %arg3: memref<1x512xf32, #tpu.memory_space<vmem>>, %arg4: memref<512x128xbf16, #tpu.memory_space<vmem>>, %arg5: memref<1x128xf32, #tpu.memory_space<vmem>>, %arg6: memref<128x128xbf16, #tpu.memory_space<vmem>>, %arg7: memref<1x128xf32, #tpu.memory_space<vmem>>, %arg8: memref<8x128xf32, #tpu.memory_space<vmem>>) attributes {dimension_semantics = [#tpu.dimension_semantics<parallel>], iteration_bounds = array<i64: 1>, scalar_prefetch = 0 : i64, scratch_operands = 0 : i64, tpu.core_type = #tpu.core_type<tc>, window_params = [{transform_indices = @transform_0, window_bounds = array<i64: 8, 896>}, {pipeline_mode = #tpu.pipeline_mode<synchronous>, transform_indices = @transform_1, window_bounds = array<i64: 896, 512>}, {pipeline_mode = #tpu.pipeline_mode<synchronous>, transform_indices = @transform_2, window_bounds = array<i64: 1, 512>}, {pipeline_mode = #tpu.pipeline_mode<synchronous>, transform_indices = @transform_3, window_bounds = array<i64: 512, 128>}, {pipeline_mode = #tpu.pipeline_mode<synchronous>, transform_indices = @transform_4, window_bounds = array<i64: 1, 128>}, {pipeline_mode = #tpu.pipeline_mode<synchronous>, transform_indices = @transform_5, window_bounds = array<i64: 128, 128>}, {pipeline_mode = #tpu.pipeline_mode<synchronous>, transform_indices = @transform_6, window_bounds = array<i64: 1, 128>}, {transform_indices = @transform_7, window_bounds = array<i64: 8, 128>}]} {
    %c0 = arith.constant 0 : index
    %c0_0 = arith.constant 0 : index
    %0 = vector.load %arg1[%c0, %c0_0] : memref<8x896xbf16, #tpu.memory_space<vmem>>, vector<8x896xbf16>
    %c0_1 = arith.constant 0 : index
    %c0_2 = arith.constant 0 : index
    %1 = vector.load %arg2[%c0_1, %c0_2] : memref<896x512xbf16, #tpu.memory_space<vmem>>, vector<896x512xbf16>
    %cst = arith.constant dense<0.000000e+00> : vector<8x512xf32>
    %2 = tpu.matmul %0, %1, %cst {dimension_numbers = #tpu.dot_dimension_numbers<[1], [0], [0], [1], [0, 0, 1, 1], [], []>} : vector<8x896xbf16>, vector<896x512xbf16>, vector<8x512xf32> -> vector<8x512xf32>
    %c0_3 = arith.constant 0 : index
    %c0_4 = arith.constant 0 : index
    %3 = vector.load %arg3[%c0_3, %c0_4] : memref<1x512xf32, #tpu.memory_space<vmem>>, vector<1x512xf32>
    %4 = vector.broadcast %3 : vector<1x512xf32> to vector<8x512xf32>
    %5 = arith.addf %2, %4 : vector<8x512xf32>
    %cst_5 = arith.constant 0.000000e+00 : f32
    %6 = vector.broadcast %cst_5 : f32 to vector<8x512xf32>
    %7 = arith.maximumf %5, %6 : vector<8x512xf32>
    %8 = arith.truncf %7 : vector<8x512xf32> to vector<8x512xbf16>
    %c0_6 = arith.constant 0 : index
    %c0_7 = arith.constant 0 : index
    %9 = vector.load %arg4[%c0_6, %c0_7] : memref<512x128xbf16, #tpu.memory_space<vmem>>, vector<512x128xbf16>
    %cst_8 = arith.constant dense<0.000000e+00> : vector<8x128xf32>
    %10 = tpu.matmul %8, %9, %cst_8 {dimension_numbers = #tpu.dot_dimension_numbers<[1], [0], [0], [1], [0, 0, 1, 1], [], []>} : vector<8x512xbf16>, vector<512x128xbf16>, vector<8x128xf32> -> vector<8x128xf32>
    %c0_9 = arith.constant 0 : index
    %c0_10 = arith.constant 0 : index
    %11 = vector.load %arg5[%c0_9, %c0_10] : memref<1x128xf32, #tpu.memory_space<vmem>>, vector<1x128xf32>
    %12 = vector.broadcast %11 : vector<1x128xf32> to vector<8x128xf32>
    %13 = arith.addf %10, %12 : vector<8x128xf32>
    %cst_11 = arith.constant 0.000000e+00 : f32
    %14 = vector.broadcast %cst_11 : f32 to vector<8x128xf32>
    %15 = arith.maximumf %13, %14 : vector<8x128xf32>
    %16 = arith.truncf %15 : vector<8x128xf32> to vector<8x128xbf16>
    %c0_12 = arith.constant 0 : index
    %c0_13 = arith.constant 0 : index
    %17 = vector.load %arg6[%c0_12, %c0_13] : memref<128x128xbf16, #tpu.memory_space<vmem>>, vector<128x128xbf16>
    %cst_14 = arith.constant dense<0.000000e+00> : vector<8x128xf32>
    %18 = tpu.matmul %16, %17, %cst_14 {dimension_numbers = #tpu.dot_dimension_numbers<[1], [0], [0], [1], [0, 0, 1, 1], [], []>} : vector<8x128xbf16>, vector<128x128xbf16>, vector<8x128xf32> -> vector<8x128xf32>
    %c0_15 = arith.constant 0 : index
    %c0_16 = arith.constant 0 : index
    %19 = vector.load %arg7[%c0_15, %c0_16] : memref<1x128xf32, #tpu.memory_space<vmem>>, vector<1x128xf32>
    %20 = vector.broadcast %19 : vector<1x128xf32> to vector<8x128xf32>
    %21 = arith.addf %18, %20 : vector<8x128xf32>
    %cst_17 = arith.constant 0.000000e+00 : f32
    %22 = vector.broadcast %cst_17 : f32 to vector<8x128xf32>
    %23 = arith.maximumf %21, %22 : vector<8x128xf32>
    %c0_18 = arith.constant 0 : index
    %c0_19 = arith.constant 0 : index
    %24 = vector.load %arg8[%c0_18, %c0_19] : memref<8x128xf32, #tpu.memory_space<vmem>>, vector<8x128xf32>
    tpu.vector_store %arg8[%c0_18, %c0_19], %23 {strides = array<i32>} : memref<8x128xf32, #tpu.memory_space<vmem>>, vector<8x128xf32>,
    return
  }
  func.func @transform_0(%arg0: i32) -> (i32, i32) {
    %c0_i32 = arith.constant 0 : i32
    %c0_i32_0 = arith.constant 0 : i32
    return %arg0, %c0_i32 : i32, i32
  }
  func.func @transform_1(%arg0: i32) -> (i32, i32) {
    %c0_i32 = arith.constant 0 : i32
    %c0_i32_0 = arith.constant 0 : i32
    %c0_i32_1 = arith.constant 0 : i32
    return %c0_i32, %c0_i32_0 : i32, i32
  }
  func.func @transform_2(%arg0: i32) -> (i32, i32) {
    %c0_i32 = arith.constant 0 : i32
    %c0_i32_0 = arith.constant 0 : i32
    %c0_i32_1 = arith.constant 0 : i32
    return %c0_i32, %c0_i32_0 : i32, i32
  }
  func.func @transform_3(%arg0: i32) -> (i32, i32) {
    %c0_i32 = arith.constant 0 : i32
    %c0_i32_0 = arith.constant 0 : i32
    %c0_i32_1 = arith.constant 0 : i32
    return %c0_i32, %c0_i32_0 : i32, i32
  }
  func.func @transform_4(%arg0: i32) -> (i32, i32) {
    %c0_i32 = arith.constant 0 : i32
    %c0_i32_0 = arith.constant 0 : i32
    %c0_i32_1 = arith.constant 0 : i32
    return %c0_i32, %c0_i32_0 : i32, i32
  }
  func.func @transform_5(%arg0: i32) -> (i32, i32) {
    %c0_i32 = arith.constant 0 : i32
    %c0_i32_0 = arith.constant 0 : i32
    %c0_i32_1 = arith.constant 0 : i32
    return %c0_i32, %c0_i32_0 : i32, i32
  }
  func.func @transform_6(%arg0: i32) -> (i32, i32) {
    %c0_i32 = arith.constant 0 : i32
    %c0_i32_0 = arith.constant 0 : i32
    %c0_i32_1 = arith.constant 0 : i32
    return %c0_i32, %c0_i32_0 : i32, i32
  }
  func.func @transform_7(%arg0: i32) -> (i32, i32) {
    %c0_i32 = arith.constant 0 : i32
    %c0_i32_0 = arith.constant 0 : i32
    return %arg0, %c0_i32 : i32, i32
  }
}

</mosaic_0001>

<bundles_post_ra>
// kernel: tpu_custom_call.1
= control target key start
LH: loop header
LB: loop body
LE: loop exit
PB: predicated region body
PF: predicated region fallthrough
CT: control target
= control target key end

     0   :  { %12 = vsyncpa [#allocation3], 0  ;;  %s3902_s0 = inlined_call_operand.hbm [shape: bf16[8,896], index: 0, kind: input, shape index: {}]   ;;  %s3903_s1 = inlined_call_operand.hbm [shape: bf16[896,512], index: 1, kind: input, shape index: {}]   ;;  %s3904_s2 = inlined_call_operand.hbm [shape: f32[1,512], index: 2, kind: input, shape index: {}]   ;;  %s3905_s3 = inlined_call_operand.hbm [shape: bf16[512,128], index: 3, kind: input, shape index: {}]   ;;  %s3906_s4 = inlined_call_operand.vmem [shape: f32[1,128], index: 4, kind: input, shape index: {}]   ;;  %s3907_s5 = inlined_call_operand.hbm [shape: bf16[128,128], index: 5, kind: input, shape index: {}]   ;;  %s3908_s6 = inlined_call_operand.vmem [shape: f32[1,128], index: 6, kind: input, shape index: {}]   ;;  %s3909_s7 = inlined_call_operand.hbm [shape: f32[8,128], index: 7, kind: output, shape index: {}]  }
   0x1   :  { %13 = vsyncpa [#allocation6], 0 }
   0x2   :  { %14 = vsyncpa [#allocation9], 0  ;;  %s31_s26 = sshll.u32 %s3903_s1, 4  ;;  %s32_s26 = int_to_ptr.hbm [resolvable:$true] %s31_s26 }
   0x3   :  { %15 = vsyncpa [#allocation4], 0  ;;  %s3756_s27 = smov [#allocation5]   ;;  %s55_s8 = sshll.u32 %s3905_s3, 4  ;;  %s56_s8 = int_to_ptr.hbm [resolvable:$true] %s55_s8 }
   0x4   :  { %s33_s28 = sshll.u32 %s3756_s27, 4  ;;  %s3757_s9 = smov 256   ;;  %s34_s28 = int_to_ptr.vmem [resolvable:$true] %s33_s28 }
   0x5   :  { %s3758_s10 = smov 16   ;;  %s3759_s11 = smov [#allocation8]  }
   0x6   :  { %39 = dma.hbm_to_vmem [thread:$0]  %s32_s26, 28672, %s34_s28, [#allocation6], %s3757_s9, %s3757_s9, %s3758_s10  }
   0x7   :  { %s57_s12 = sshll.u32 %s3759_s11, 4  ;;  %s3760_s13 = smov 64   ;;  %s58_s12 = int_to_ptr.vmem [resolvable:$true] %s57_s12 }
   0x8   :  { %s3761_s14 = smov 4   ;;  %s21_s16 = sshll.u32 %s3902_s0, 4  ;;  %s22_s16 = int_to_ptr.hbm [resolvable:$true] %s21_s16 }
   0x9   :  { %63 = dma.hbm_to_vmem [thread:$0]  %s56_s8, 4096, %s58_s12, [#allocation9], %s3760_s13, %s3760_s13, %s3761_s14  }
   0xa   :  { %s3762_s17 = smov [#allocation2]   ;;  %s45_s20 = sshll.u32 %s3904_s2, 4  ;;  %s46_s20 = int_to_ptr.hbm [resolvable:$true] %s45_s20 }
   0xb   :  { %s23_s18 = sshll.u32 %s3762_s17, 4  ;;  %s3763_s21 = smov [#allocation7]   ;;  %s24_s18 = int_to_ptr.vmem [resolvable:$true] %s23_s18 }
   0xc   :  { %26 = dma.hbm_to_vmem [thread:$0]  %s22_s16, 448, %s24_s18, [#allocation3]  }
   0xd   :  { %s47_s22 = sshll.u32 %s3763_s21, 4  ;;  %s70_s25 = sshll.u32 %s3907_s5, 4  ;;  %s48_s22 = int_to_ptr.vmem [resolvable:$true] %s47_s22  ;;  %s71_s25 = int_to_ptr.hbm [resolvable:$true] %s70_s25 }
   0xe   :  { %50 = dma.hbm_to_vmem [thread:$0]  %s46_s20, 64, %s48_s22, [#allocation6]  }
   0xf   :  { %s3764_s0 = smov [#allocation10]  }
  0x10   :  { %s72_s26 = sshll.u32 %s3764_s0, 4  ;;  %s73_s26 = int_to_ptr.vmem [resolvable:$true] %s72_s26 }
  0x11   :  { %78 = dma.hbm_to_vmem [thread:$0]  %s71_s25, 1024, %s73_s26, [#allocation9], %s3760_s13, %s3760_s13, %s3761_s14  }
  0x12   :  { %3748 = dma.done.wait [#allocation3], 448  }
  0x13   :  { %3749 = vsyncadd [#allocation3], 4294966848 }
  0x14   :  { %3750 = dma.done.wait [#allocation6], 28736  }
  0x15   :  { %3751 = vsyncadd [#allocation6], 4294938560 }
  0x16   :  { %3752 = dma.done.wait [#allocation9], 5120  }
  0x17   :  { %3753 = vsyncadd [#allocation9], 4294962176  ;;  %v2386_v0 = vld [vmem:[#allocation5 + $0xe0] sm:$0xf]  ;;  %v3358_v1 = vld [vmem:[#allocation5 + $0xec] sm:$0xf0] }
  0x18   :  { %v2514_v2 = vld [vmem:[#allocation5 + $0x1e0] sm:$0xf]  ;;  %v2387_v3 = vor.u32 %v3358_v1, %v2386_v0  ;;  %v3390_v4 = vld [vmem:[#allocation5 + $0x1ec] sm:$0xf0]  ;;  %s3765_s28 = smov [#allocation11]   ;;  %s2260_s9 = sshll.u32 %s3909_s7, 4  ;;  %s2261_s9 = int_to_ptr.hbm [resolvable:$true] %s2260_s9 }
  0x19   :  { %v2642_v5 = vld [vmem:[#allocation5 + $0x2e0] sm:$0xf]  ;;  %v3422_v6 = vld [vmem:[#allocation5 + $0x2ec] sm:$0xf0]  ;;  %v2515_v7 = vor.u32 %v3390_v4, %v2514_v2  ;;  %s2258_s29 = sshll.u32 %s3765_s28, 4  ;;  %s2259_s29 = int_to_ptr.vmem [resolvable:$true] %s2258_s29 }
  0x1a   :  { %v2643_v8 = vor.u32 %v3422_v6, %v2642_v5  ;;  %v2770_v9 = vld [vmem:[#allocation5 + $0x3e0] sm:$0xf]  ;;  %v3454_v10 = vld [vmem:[#allocation5 + $0x3ec] sm:$0xf0]  ;;  %1484 = vmatpush.bf16.msra.mxu0 %v2387_v3 }
  0x1b   :  { %v2370_v11 = vld [vmem:[#allocation5 + $0xc0] sm:$0xf]  ;;  %v2771_v12 = vor.u32 %v3454_v10, %v2770_v9  ;;  %v3354_v13 = vld [vmem:[#allocation5 + $0xcc] sm:$0xf0]  ;;  %1497 = vmatpush.bf16.msra.mxu1 %v2515_v7 }
  0x1c   :  { %v2498_v14 = vld [vmem:[#allocation5 + $0x1c0] sm:$0xf]  ;;  %v3386_v15 = vld [vmem:[#allocation5 + $0x1cc] sm:$0xf0]  ;;  %1510 = vmatpush.bf16.msra.mxu2 %v2643_v8  ;;  %v2371_v16 = vor.u32 %v3354_v13, %v2370_v11 }
  0x1d   :  { %v2499_v17 = vor.u32 %v3386_v15, %v2498_v14  ;;  %v2626_v18 = vld [vmem:[#allocation5 + $0x2c0] sm:$0xf]  ;;  %v3418_v19 = vld [vmem:[#allocation5 + $0x2cc] sm:$0xf0]  ;;  %1523 = vmatpush.bf16.msra.mxu3 %v2771_v12 }
  0x1e   :  { %v2754_v20 = vld [vmem:[#allocation5 + $0x3c0] sm:$0xf]  ;;  %v2627_v21 = vor.u32 %v3418_v19, %v2626_v18  ;;  %v3450_v22 = vld [vmem:[#allocation5 + $0x3cc] sm:$0xf0]  ;;  %1485 = vmatpush.bf16.msra.mxu0 %v2371_v16 }
  0x1f   :  { %v2354_v23 = vld [vmem:[#allocation5 + $0xa0] sm:$0xf]  ;;  %v3350_v24 = vld [vmem:[#allocation5 + $0xac] sm:$0xf0]  ;;  %v2755_v25 = vor.u32 %v3450_v22, %v2754_v20  ;;  %1498 = vmatpush.bf16.msra.mxu1 %v2499_v17 }
  0x20   :  { %v2482_v26 = vld [vmem:[#allocation5 + $0x1a0] sm:$0xf]  ;;  %v3382_v27 = vld [vmem:[#allocation5 + $0x1ac] sm:$0xf0]  ;;  %v2355_v29 = vor.u32 %v3350_v24, %v2354_v23  ;;  %1511 = vmatpush.bf16.msra.mxu2 %v2627_v21 }
  0x21   :  { %v2610_v28 = vld [vmem:[#allocation5 + $0x2a0] sm:$0xf]  ;;  %v3414_v30 = vld [vmem:[#allocation5 + $0x2ac] sm:$0xf0]  ;;  %v2483_v33 = vor.u32 %v3382_v27, %v2482_v26  ;;  %1524 = vmatpush.bf16.msra.mxu3 %v2755_v25 }
  0x22   :  { %v2738_v31 = vld [vmem:[#allocation5 + $0x3a0] sm:$0xf]  ;;  %v3446_v32 = vld [vmem:[#allocation5 + $0x3ac] sm:$0xf0]  ;;  %v2611_v34 = vor.u32 %v3414_v30, %v2610_v28  ;;  %1486 = vmatpush.bf16.msra.mxu0 %v2355_v29 }
  0x23   :  { %v2338_v35 = vld [vmem:[#allocation5 + $0x80] sm:$0xf]  ;;  %v3346_v36 = vld [vmem:[#allocation5 + $0x8c] sm:$0xf0]  ;;  %v2739_v38 = vor.u32 %v3446_v32, %v2738_v31  ;;  %1499 = vmatpush.bf16.msra.mxu1 %v2483_v33 }
  0x24   :  { %v2466_v37 = vld [vmem:[#allocation5 + $0x180] sm:$0xf]  ;;  %v3378_v39 = vld [vmem:[#allocation5 + $0x18c] sm:$0xf0]  ;;  %v2339_v44 = vor.u32 %v3346_v36, %v2338_v35  ;;  %1512 = vmatpush.bf16.msra.mxu2 %v2611_v34 }
  0x25   :  { %v2594_v40 = vld [vmem:[#allocation5 + $0x280] sm:$0xf]  ;;  %v3410_v41 = vld [vmem:[#allocation5 + $0x28c] sm:$0xf0]  ;;  %v2467_v45 = vor.u32 %v3378_v39, %v2466_v37  ;;  %1525 = vmatpush.bf16.msra.mxu3 %v2739_v38  ;;  %v3356_v37 = vld [vmem:[#allocation5 + $0xe4] sm:$0xf] }
  0x26   :  { %v2722_v42 = vld [vmem:[#allocation5 + $0x380] sm:$0xf]  ;;  %v3442_v43 = vld [vmem:[#allocation5 + $0x38c] sm:$0xf0]  ;;  %v2595_v46 = vor.u32 %v3410_v41, %v2594_v40  ;;  %1487 = vmatpush.bf16.msra.mxu0 %v2339_v44  ;;  %v2388_v38 = vld [vmem:[#allocation5 + $0xf0] sm:$0xf0] }
  0x27   :  { %v2322_v47 = vld [vmem:[#allocation5 + $0x60] sm:$0xf]  ;;  %v3342_v48 = vld [vmem:[#allocation5 + $0x6c] sm:$0xf0]  ;;  %v2723_v50 = vor.u32 %v3442_v43, %v2722_v42  ;;  %1500 = vmatpush.bf16.msra.mxu1 %v2467_v45 }
  0x28   :  { %v2450_v49 = vld [vmem:[#allocation5 + $0x160] sm:$0xf]  ;;  %v3374_v51 = vld [vmem:[#allocation5 + $0x16c] sm:$0xf0]  ;;  %v2323_v56 = vor.u32 %v3342_v48, %v2322_v47  ;;  %1513 = vmatpush.bf16.msra.mxu2 %v2595_v46  ;;  %v2391_v46 = vor.u32 %v3356_v37, %v2388_v38 }
  0x29   :  { %v2578_v52 = vld [vmem:[#allocation5 + $0x260] sm:$0xf]  ;;  %v3406_v53 = vld [vmem:[#allocation5 + $0x26c] sm:$0xf0]  ;;  %v2451_v57 = vor.u32 %v3374_v51, %v2450_v49  ;;  %1526 = vmatpush.bf16.msra.mxu3 %v2723_v50  ;;  %v3352_v50 = vld [vmem:[#allocation5 + $0xc4] sm:$0xf] }
  0x2a   :  { %v2706_v54 = vld [vmem:[#allocation5 + $0x360] sm:$0xf]  ;;  %v3438_v55 = vld [vmem:[#allocation5 + $0x36c] sm:$0xf0]  ;;  %v2579_v58 = vor.u32 %v3406_v53, %v2578_v52  ;;  %1488 = vmatpush.bf16.msra.mxu0 %v2323_v56  ;;  %v2372_v51 = vld [vmem:[#allocation5 + $0xd0] sm:$0xf0] }
  0x2b   :  { %v2306_v59 = vld [vmem:[#allocation5 + $0x40] sm:$0xf]  ;;  %v3338_v60 = vld [vmem:[#allocation5 + $0x4c] sm:$0xf0]  ;;  %v2707_v62 = vor.u32 %v3438_v55, %v2706_v54  ;;  %1501 = vmatpush.bf16.msra.mxu1 %v2451_v57 }
  0x2c   :  { %v2434_v61 = vld [vmem:[#allocation5 + $0x140] sm:$0xf]  ;;  %v3370_v63 = vld [vmem:[#allocation5 + $0x14c] sm:$0xf0]  ;;  %v2307_v4 = vor.u32 %v3338_v60, %v2306_v59  ;;  %1514 = vmatpush.bf16.msra.mxu2 %v2579_v58  ;;  %v2375_v59 = vor.u32 %v3352_v50, %v2372_v51 }
  0x2d   :  { %v2562_v0 = vld [vmem:[#allocation5 + $0x240] sm:$0xf]  ;;  %v3402_v1 = vld [vmem:[#allocation5 + $0x24c] sm:$0xf0]  ;;  %v2435_v5 = vor.u32 %v3370_v63, %v2434_v61  ;;  %1527 = vmatpush.bf16.msra.mxu3 %v2707_v62  ;;  %v3348_v62 = vld [vmem:[#allocation5 + $0xa4] sm:$0xf] }
  0x2e   :  { %v2690_v2 = vld [vmem:[#allocation5 + $0x340] sm:$0xf]  ;;  %v3434_v3 = vld [vmem:[#allocation5 + $0x34c] sm:$0xf0]  ;;  %v2563_v6 = vor.u32 %v3402_v1, %v2562_v0  ;;  %1489 = vmatpush.bf16.msra.mxu0 %v2307_v4  ;;  %v2356_v63 = vld [vmem:[#allocation5 + $0xb0] sm:$0xf0] }
  0x2f   :  { %v2290_v7 = vld [vmem:[#allocation5 + $0x20] sm:$0xf]  ;;  %v3334_v8 = vld [vmem:[#allocation5 + $0x2c] sm:$0xf0]  ;;  %v2691_v10 = vor.u32 %v3434_v3, %v2690_v2  ;;  %1502 = vmatpush.bf16.msra.mxu1 %v2435_v5  ;;  %v101_v3 = vld [vmem:[#allocation2] sm:$0xff] }
  0x30   :  { %v2418_v9 = vld [vmem:[#allocation5 + $0x120] sm:$0xf]  ;;  %v3366_v11 = vld [vmem:[#allocation5 + $0x12c] sm:$0xf0]  ;;  %v2291_v16 = vor.u32 %v3334_v8, %v2290_v7  ;;  %1515 = vmatpush.bf16.msra.mxu2 %v2563_v6 }
  0x31   :  { %v2546_v12 = vld [vmem:[#allocation5 + $0x220] sm:$0xf]  ;;  %v3398_v13 = vld [vmem:[#allocation5 + $0x22c] sm:$0xf0]  ;;  %v2419_v19 = vor.u32 %v3366_v11, %v2418_v9  ;;  %1528 = vmatpush.bf16.msra.mxu3 %v2691_v10  ;;  %v343_v9 = vunpack.c.l.b16 %v101_v3  ;;  %v2359_v11 = vor.u32 %v3348_v62, %v2356_v63 }
  0x32   :  { %v2674_v14 = vld [vmem:[#allocation5 + $0x320] sm:$0xf]  ;;  %v3430_v15 = vld [vmem:[#allocation5 + $0x32c] sm:$0xf0]  ;;  %v2547_v20 = vor.u32 %v3398_v13, %v2546_v12  ;;  %1490 = vmatpush.bf16.msra.mxu0 %v2291_v16  ;;  %v3344_v16 = vld [vmem:[#allocation5 + $0x84] sm:$0xf] }
  0x33   :  { %v2274_v17 = vld [vmem:[#allocation5] sm:$0xf]  ;;  %v3330_v18 = vld [vmem:[#allocation5 + $0xc] sm:$0xf0]  ;;  %v2675_v24 = vor.u32 %v3430_v15, %v2674_v14  ;;  %1503 = vmatpush.bf16.msra.mxu1 %v2419_v19  ;;  %v344_v15 = vunpack.c.h.b16 %v101_v3  ;;  %v3823_v19 = vpack.c.b16 %v343_v9, %v343_v9  ;;  %v104_v3 = vld [vmem:[#allocation2 + $0x18] sm:$0xf] }
  0x34   :  { %v2402_v21 = vld [vmem:[#allocation5 + $0x100] sm:$0xf]  ;;  %v3362_v22 = vld [vmem:[#allocation5 + $0x10c] sm:$0xf0]  ;;  %v2275_v31 = vor.u32 %v3330_v18, %v2274_v17  ;;  %1516 = vmatpush.bf16.msra.mxu2 %v2547_v20  ;;  %v2340_v17 = vld [vmem:[#allocation5 + $0x90] sm:$0xf0] }
  0x35   :  { %v2530_v23 = vld [vmem:[#allocation5 + $0x200] sm:$0xf]  ;;  %v3394_v25 = vld [vmem:[#allocation5 + $0x20c] sm:$0xf0]  ;;  %v2403_v35 = vor.u32 %v3362_v22, %v2402_v21  ;;  %1529 = vmatpush.bf16.msra.mxu3 %v2675_v24  ;;  %v3827_v22 = vpack.c.b16 %v344_v15, %v344_v15  ;;  %v2516_v9 = vld [vmem:[#allocation5 + $0x1f0] sm:$0xf0]  ;;  %v349_v15 = vunpack.c.l.b16 %v104_v3 }
  0x36   :  { %v2658_v26 = vld [vmem:[#allocation5 + $0x300] sm:$0xf]  ;;  %v3426_v27 = vld [vmem:[#allocation5 + $0x30c] sm:$0xf0]  ;;  %v2531_v36 = vor.u32 %v3394_v25, %v2530_v23  ;;  %1491 = vmatpush.bf16.msra.mxu0 %v2275_v31 }
  0x37   :  { %v2898_v28 = vld [vmem:[#allocation5 + $0x4e0] sm:$0xf]  ;;  %v3486_v29 = vld [vmem:[#allocation5 + $0x4ec] sm:$0xf0]  ;;  %v2659_v39 = vor.u32 %v3426_v27, %v2658_v26  ;;  %1504 = vmatpush.bf16.msra.mxu1 %v2403_v35 }
  0x38   :  { %v3026_v30 = vld [vmem:[#allocation5 + $0x5e0] sm:$0xf]  ;;  %v3518_v32 = vld [vmem:[#allocation5 + $0x5ec] sm:$0xf0]  ;;  %v2899_v40 = vor.u32 %v3486_v29, %v2898_v28  ;;  %1517 = vmatpush.bf16.msra.mxu2 %v2531_v36  ;;  %v2343_v28 = vor.u32 %v3344_v16, %v2340_v17 }
  0x39   :  { %v3154_v33 = vld [vmem:[#allocation5 + $0x6e0] sm:$0xf]  ;;  %v3550_v34 = vld [vmem:[#allocation5 + $0x6ec] sm:$0xf0]  ;;  %v3027_v41 = vor.u32 %v3518_v32, %v3026_v30  ;;  %1530 = vmatpush.bf16.msra.mxu3 %v2659_v39  ;;  %v3340_v32 = vld [vmem:[#allocation5 + $0x64] sm:$0xf]  ;;  %1492 = vmatmul.bf16.vlgmr.msra.gmra.mxu0 %v3823_v19 }
  0x3a   :  { %v3155_v42 = vor.u32 %v3550_v34, %v3154_v33  ;;  %v2882_v43 = vld [vmem:[#allocation5 + $0x4c0] sm:$0xf]  ;;  %v3482_v44 = vld [vmem:[#allocation5 + $0x4cc] sm:$0xf0]  ;;  %1536 = vmatpush.bf16.msrb.mxu0 %v2899_v40  ;;  %v2324_v33 = vld [vmem:[#allocation5 + $0x70] sm:$0xf0]  ;;  %1505 = vmatmul.bf16.vlgmr.msra.gmra.mxu1 %v3827_v22 }
  0x3b   :  { %v3010_v45 = vld [vmem:[#allocation5 + $0x5c0] sm:$0xf]  ;;  %v3514_v47 = vld [vmem:[#allocation5 + $0x5cc] sm:$0xf0]  ;;  %v2883_v52 = vor.u32 %v3482_v44, %v2882_v43  ;;  %1549 = vmatpush.bf16.msrb.mxu1 %v3027_v41  ;;  %v2327_v40 = vor.u32 %v3340_v32, %v2324_v33  ;;  %v3336_v44 = vld [vmem:[#allocation5 + $0x44] sm:$0xf] }
  0x3c   :  { %v3138_v48 = vld [vmem:[#allocation5 + $0x6c0] sm:$0xf]  ;;  %v3546_v49 = vld [vmem:[#allocation5 + $0x6cc] sm:$0xf0]  ;;  %1562 = vmatpush.bf16.msrb.mxu2 %v3155_v42  ;;  %v3011_v54 = vor.u32 %v3514_v47, %v3010_v45  ;;  %v2308_v45 = vld [vmem:[#allocation5 + $0x50] sm:$0xf0] }
  0x3d   :  { %v2866_v53 = vld [vmem:[#allocation5 + $0x4a0] sm:$0xf]  ;;  %v3139_v55 = vor.u32 %v3546_v49, %v3138_v48  ;;  %v3478_v56 = vld [vmem:[#allocation5 + $0x4ac] sm:$0xf0]  ;;  %1575 = vmatpush.bf16.msrb.mxu3 %v2391_v46  ;;  %v3416_v32 = vld [vmem:[#allocation5 + $0x2c4] sm:$0xf] }
  0x3e   :  { %v2994_v57 = vld [vmem:[#allocation5 + $0x5a0] sm:$0xf]  ;;  %v3510_v58 = vld [vmem:[#allocation5 + $0x5ac] sm:$0xf0]  ;;  %1537 = vmatpush.bf16.msrb.mxu0 %v2883_v52  ;;  %v2867_v0 = vor.u32 %v3478_v56, %v2866_v53  ;;  %v2311_v52 = vor.u32 %v3336_v44, %v2308_v45  ;;  %v3332_v56 = vld [vmem:[#allocation5 + $0x24] sm:$0xf] }
  0x3f   :  { %v3122_v60 = vld [vmem:[#allocation5 + $0x6a0] sm:$0xf]  ;;  %v3542_v61 = vld [vmem:[#allocation5 + $0x6ac] sm:$0xf0]  ;;  %v2995_v1 = vor.u32 %v3510_v58, %v2994_v57  ;;  %1550 = vmatpush.bf16.msrb.mxu1 %v3011_v54  ;;  %v2292_v57 = vld [vmem:[#allocation5 + $0x30] sm:$0xf0] }
  0x40   :  { %v102_v2 = vld [vmem:[#allocation2 + $0x8] sm:$0xff]  ;;  %1563 = vmatpush.bf16.msrb.mxu2 %v3139_v55  ;;  %v3123_v4 = vor.u32 %v3542_v61, %v3122_v60  ;;  %v2850_v5 = vld [vmem:[#allocation5 + $0x480] sm:$0xf]  ;;  %v3380_v45 = vld [vmem:[#allocation5 + $0x1a4] sm:$0xf] }
  0x41   :  { %v3474_v6 = vld [vmem:[#allocation5 + $0x48c] sm:$0xf0]  ;;  %v2978_v7 = vld [vmem:[#allocation5 + $0x580] sm:$0xf]  ;;  %v345_v8 = vunpack.c.l.b16 %v102_v2  ;;  %v346_v10 = vunpack.c.h.b16 %v102_v2  ;;  %1576 = vmatpush.bf16.msrb.mxu3 %v2375_v59 }
  0x42   :  { %v3506_v12 = vld [vmem:[#allocation5 + $0x58c] sm:$0xf0]  ;;  %v3106_v13 = vld [vmem:[#allocation5 + $0x680] sm:$0xf]  ;;  %1538 = vmatpush.bf16.msrb.mxu0 %v2867_v0  ;;  %v2851_v21 = vor.u32 %v3474_v6, %v2850_v5  ;;  %v3328_v5 = vld [vmem:[#allocation5 + $0x4] sm:$0xf] }
  0x43   :  { %v3538_v14 = vld [vmem:[#allocation5 + $0x68c] sm:$0xf0]  ;;  %v3821_v18 = vpack.c.b16 %v345_v8, %v345_v8  ;;  %v3825_v20 = vpack.c.b16 %v346_v10, %v346_v10  ;;  %1551 = vmatpush.bf16.msrb.mxu1 %v2995_v1  ;;  %v2979_v23 = vor.u32 %v3506_v12, %v2978_v7  ;;  %v2834_v25 = vld [vmem:[#allocation5 + $0x460] sm:$0xf]  ;;  %v2276_v6 = vld [vmem:[#allocation5 + $0x10] sm:$0xf0] }
  0x44   :  { %1564 = vmatpush.bf16.msrb.mxu2 %v3123_v4  ;;  %v3107_v24 = vor.u32 %v3538_v14, %v3106_v13  ;;  %v3470_v26 = vld [vmem:[#allocation5 + $0x46c] sm:$0xf0]  ;;  %v2962_v27 = vld [vmem:[#allocation5 + $0x560] sm:$0xf]  ;;  %v2295_v4 = vor.u32 %v3332_v56, %v2292_v57  ;;  %v103_v7 = vld [vmem:[#allocation2 + $0x10] sm:$0xff] }
  0x45   :  { %1577 = vmatpush.bf16.msrb.mxu3 %v2359_v11  ;;  %v3502_v29 = vld [vmem:[#allocation5 + $0x56c] sm:$0xf0]  ;;  %v3090_v30 = vld [vmem:[#allocation5 + $0x660] sm:$0xf]  ;;  %1518 = vmatmul.bf16.vlgmr.msra.gmra.mxu2 %v3821_v18  ;;  %v2835_v34 = vor.u32 %v3470_v26, %v2834_v25  ;;  %v3388_v8 = vld [vmem:[#allocation5 + $0x1e4] sm:$0xf]  ;;  %v348_v25 = vunpack.c.h.b16 %v103_v7  ;;  %v2279_v26 = vor.u32 %v3328_v5, %v2276_v6 }
  0x46   :  { %v3534_v31 = vld [vmem:[#allocation5 + $0x66c] sm:$0xf0]  ;;  %1531 = vmatmul.bf16.vlgmr.msra.gmra.mxu3 %v3825_v20  ;;  %1539 = vmatpush.bf16.msrb.mxu0 %v2851_v21  ;;  %v2963_v35 = vor.u32 %v3502_v29, %v2962_v27  ;;  %v2818_v37 = vld [vmem:[#allocation5 + $0x440] sm:$0xf]  ;;  %v3420_v10 = vld [vmem:[#allocation5 + $0x2e4] sm:$0xf]  ;;  %v2519_v27 = vor.u32 %v3388_v8, %v2516_v9 }
  0x47   :  { %1552 = vmatpush.bf16.msrb.mxu1 %v2979_v23  ;;  %v3091_v36 = vor.u32 %v3534_v31, %v3090_v30  ;;  %v3466_v38 = vld [vmem:[#allocation5 + $0x44c] sm:$0xf0]  ;;  %v2946_v39 = vld [vmem:[#allocation5 + $0x540] sm:$0xf]  ;;  %v2644_v12 = vld [vmem:[#allocation5 + $0x2f0] sm:$0xf0] }
  0x48   :  { %1565 = vmatpush.bf16.msrb.mxu2 %v3107_v24  ;;  %v3498_v41 = vld [vmem:[#allocation5 + $0x54c] sm:$0xf0]  ;;  %v3074_v42 = vld [vmem:[#allocation5 + $0x640] sm:$0xf]  ;;  %v2819_v46 = vor.u32 %v3466_v38, %v2818_v37  ;;  %v3452_v13 = vld [vmem:[#allocation5 + $0x3e4] sm:$0xf]  ;;  %v347_v24 = vunpack.c.l.b16 %v103_v7  ;;  %v3833_v37 = vpack.c.b16 %v349_v15, %v349_v15 }
  0x49   :  { %1578 = vmatpush.bf16.msrb.mxu3 %v2343_v28  ;;  %v3530_v43 = vld [vmem:[#allocation5 + $0x64c] sm:$0xf0]  ;;  %v2947_v47 = vor.u32 %v3498_v41, %v2946_v39  ;;  %v2802_v49 = vld [vmem:[#allocation5 + $0x420] sm:$0xf]  ;;  %v2772_v14 = vld [vmem:[#allocation5 + $0x3f0] sm:$0xf0]  ;;  %v2647_v28 = vor.u32 %v3420_v10, %v2644_v12  ;;  %v3837_v41 = vpack.c.b16 %v348_v25, %v348_v25 }
  0x4a   :  { %1540 = vmatpush.bf16.msrb.mxu0 %v2835_v34  ;;  %v3075_v48 = vor.u32 %v3530_v43, %v3074_v42  ;;  %v3462_v50 = vld [vmem:[#allocation5 + $0x42c] sm:$0xf0]  ;;  %v2930_v51 = vld [vmem:[#allocation5 + $0x520] sm:$0xf]  ;;  %v3484_v21 = vld [vmem:[#allocation5 + $0x4e4] sm:$0xf]  ;;  %v2775_v29 = vor.u32 %v3452_v13, %v2772_v14 }
  0x4b   :  { %1553 = vmatpush.bf16.msrb.mxu1 %v2963_v35  ;;  %v3494_v53 = vld [vmem:[#allocation5 + $0x52c] sm:$0xf0]  ;;  %v3058_v54 = vld [vmem:[#allocation5 + $0x620] sm:$0xf]  ;;  %v2803_v59 = vor.u32 %v3462_v50, %v2802_v49  ;;  %v2900_v23 = vld [vmem:[#allocation5 + $0x4f0] sm:$0xf0] }
  0x4c   :  { %1566 = vmatpush.bf16.msrb.mxu2 %v3091_v36  ;;  %v3526_v55 = vld [vmem:[#allocation5 + $0x62c] sm:$0xf0]  ;;  %v2786_v58 = vld [vmem:[#allocation5 + $0x400] sm:$0xf]  ;;  %v2931_v63 = vor.u32 %v3494_v53, %v2930_v51  ;;  %v3384_v30 = vld [vmem:[#allocation5 + $0x1c4] sm:$0xf]  ;;  %v2903_v33 = vor.u32 %v3484_v21, %v2900_v23 }
  0x4d   :  { %1579 = vmatpush.bf16.msrb.mxu3 %v2327_v40  ;;  %v3458_v60 = vld [vmem:[#allocation5 + $0x40c] sm:$0xf0]  ;;  %v2914_v61 = vld [vmem:[#allocation5 + $0x500] sm:$0xf]  ;;  %v3059_v0 = vor.u32 %v3526_v55, %v3058_v54  ;;  %v2500_v31 = vld [vmem:[#allocation5 + $0x1d0] sm:$0xf0]  ;;  %v3835_v40 = vpack.c.b16 %v347_v24, %v347_v24 }
  0x4e   :  { %1541 = vmatpush.bf16.msrb.mxu0 %v2819_v46  ;;  %v3490_v62 = vld [vmem:[#allocation5 + $0x50c] sm:$0xf0]  ;;  %v3042_v1 = vld [vmem:[#allocation5 + $0x600] sm:$0xf]  ;;  %v2787_v11 = vor.u32 %v3458_v60, %v2786_v58  ;;  %v2628_v34 = vld [vmem:[#allocation5 + $0x2d0] sm:$0xf0]  ;;  %v2503_v42 = vor.u32 %v3384_v30, %v2500_v31 }
  0x4f   :  { %1554 = vmatpush.bf16.msrb.mxu1 %v2947_v47  ;;  %v3522_v2 = vld [vmem:[#allocation5 + $0x60c] sm:$0xf0]  ;;  %v2915_v16 = vor.u32 %v3490_v62, %v2914_v61  ;;  %v3448_v35 = vld [vmem:[#allocation5 + $0x3c4] sm:$0xf]  ;;  %v2756_v36 = vld [vmem:[#allocation5 + $0x3d0] sm:$0xf0]  ;;  %v2631_v43 = vor.u32 %v3416_v32, %v2628_v34 }
  0x50   :  { %1567 = vmatpush.bf16.msrb.mxu2 %v3075_v48  ;;  %v3043_v17 = vor.u32 %v3522_v2, %v3042_v1  ;;  %v3480_v38 = vld [vmem:[#allocation5 + $0x4c4] sm:$0xf]  ;;  %v2884_v39 = vld [vmem:[#allocation5 + $0x4d0] sm:$0xf0]  ;;  %v2759_v44 = vor.u32 %v3448_v35, %v2756_v36 }
  0x51   :  { %1580 = vmatpush.bf16.msrb.mxu3 %v2311_v52  ;;  %v2484_v46 = vld [vmem:[#allocation5 + $0x1b0] sm:$0xf0]  ;;  %v3412_v47 = vld [vmem:[#allocation5 + $0x2a4] sm:$0xf]  ;;  %v2887_v48 = vor.u32 %v3480_v38, %v2884_v39 }
  0x52   :  { %1542 = vmatpush.bf16.msrb.mxu0 %v2803_v59  ;;  %v2612_v49 = vld [vmem:[#allocation5 + $0x2b0] sm:$0xf0]  ;;  %v3444_v50 = vld [vmem:[#allocation5 + $0x3a4] sm:$0xf]  ;;  %v2487_v54 = vor.u32 %v3380_v45, %v2484_v46 }
  0x53   :  { %1555 = vmatpush.bf16.msrb.mxu1 %v2931_v63  ;;  %v2740_v51 = vld [vmem:[#allocation5 + $0x3b0] sm:$0xf0]  ;;  %v3476_v52 = vld [vmem:[#allocation5 + $0x4a4] sm:$0xf]  ;;  %v2615_v55 = vor.u32 %v3412_v47, %v2612_v49 }
  0x54   :  { %1568 = vmatpush.bf16.msrb.mxu2 %v3059_v0  ;;  %v2868_v53 = vld [vmem:[#allocation5 + $0x4b0] sm:$0xf0]  ;;  %v2743_v56 = vor.u32 %v3444_v50, %v2740_v51  ;;  %v3376_v57 = vld [vmem:[#allocation5 + $0x184] sm:$0xf] }
  0x55   :  { %1581 = vmatpush.bf16.msrb.mxu3 %v2295_v4  ;;  %v2468_v58 = vld [vmem:[#allocation5 + $0x190] sm:$0xf0]  ;;  %v3408_v59 = vld [vmem:[#allocation5 + $0x284] sm:$0xf]  ;;  %v2871_v60 = vor.u32 %v3476_v52, %v2868_v53 }
  0x56   :  { %1543 = vmatpush.bf16.msrb.mxu0 %v2787_v11  ;;  %v2596_v61 = vld [vmem:[#allocation5 + $0x290] sm:$0xf0]  ;;  %v3440_v62 = vld [vmem:[#allocation5 + $0x384] sm:$0xf]  ;;  %v2471_v2 = vor.u32 %v3376_v57, %v2468_v58 }
  0x57   :  { %1556 = vmatpush.bf16.msrb.mxu1 %v2915_v16  ;;  %v2724_v63 = vld [vmem:[#allocation5 + $0x390] sm:$0xf0]  ;;  %v3472_v0 = vld [vmem:[#allocation5 + $0x484] sm:$0xf]  ;;  %v2599_v3 = vor.u32 %v3408_v59, %v2596_v61 }
  0x58   :  { %1569 = vmatpush.bf16.msrb.mxu2 %v3043_v17  ;;  %v2852_v1 = vld [vmem:[#allocation5 + $0x490] sm:$0xf0]  ;;  %v2727_v4 = vor.u32 %v3440_v62, %v2724_v63  ;;  %v3372_v5 = vld [vmem:[#allocation5 + $0x164] sm:$0xf]  ;;  %v2394_v62 = vld [vmem:[#allocation5 + $0xe8] sm:$0xf] }
  0x59   :  { %1582 = vmatpush.bf16.msrb.mxu3 %v2279_v26  ;;  %1544 = vmatmul.bf16.vlgmr.msrb.gmra.mxu0 %v3835_v40  ;;  %v2452_v6 = vld [vmem:[#allocation5 + $0x170] sm:$0xf0]  ;;  %v3404_v7 = vld [vmem:[#allocation5 + $0x264] sm:$0xf]  ;;  %v2855_v8 = vor.u32 %v3472_v0, %v2852_v1  ;;  %v3359_v63 = vld [vmem:[#allocation5 + $0xf4] sm:$0xf0] }
  0x5a   :  { %1588 = vmatpush.bf16.msra.mxu0 %v2519_v27  ;;  %1557 = vmatmul.bf16.vlgmr.msrb.gmra.mxu1 %v3837_v41  ;;  %v2580_v9 = vld [vmem:[#allocation5 + $0x270] sm:$0xf0]  ;;  %v3436_v10 = vld [vmem:[#allocation5 + $0x364] sm:$0xf]  ;;  %v2455_v14 = vor.u32 %v3372_v5, %v2452_v6 }
  0x5b   :  { %1601 = vmatpush.bf16.msra.mxu1 %v2647_v28  ;;  %1570 = vmatmul.bf16.vlgmr.msrb.gmra.mxu2 %v3833_v37  ;;  %v2708_v11 = vld [vmem:[#allocation5 + $0x370] sm:$0xf0]  ;;  %v3468_v12 = vld [vmem:[#allocation5 + $0x464] sm:$0xf]  ;;  %v2583_v15 = vor.u32 %v3404_v7, %v2580_v9  ;;  %v2395_v7 = vor.u32 %v3359_v63, %v2394_v62 }
  0x5c   :  { %1614 = vmatpush.bf16.msra.mxu2 %v2775_v29  ;;  %1583 = vmatmul.bf16.vlgmr.msrb.gmra.mxu3 %v3823_v19  ;;  %v2836_v13 = vld [vmem:[#allocation5 + $0x470] sm:$0xf0]  ;;  %v2711_v16 = vor.u32 %v3436_v10, %v2708_v11  ;;  %v3368_v17 = vld [vmem:[#allocation5 + $0x144] sm:$0xf] }
  0x5d   :  { %1627 = vmatpush.bf16.msra.mxu3 %v2903_v33  ;;  %v2436_v21 = vld [vmem:[#allocation5 + $0x150] sm:$0xf0]  ;;  %v3400_v23 = vld [vmem:[#allocation5 + $0x244] sm:$0xf]  ;;  %v2839_v24 = vor.u32 %v3468_v12, %v2836_v13  ;;  %v2378_v13 = vld [vmem:[#allocation5 + $0xc8] sm:$0xf] }
  0x5e   :  { %1589 = vmatpush.bf16.msra.mxu0 %v2503_v42  ;;  %v2564_v25 = vld [vmem:[#allocation5 + $0x250] sm:$0xf0]  ;;  %v3432_v26 = vld [vmem:[#allocation5 + $0x344] sm:$0xf]  ;;  %v2439_v30 = vor.u32 %v3368_v17, %v2436_v21 }
  0x5f   :  { %1602 = vmatpush.bf16.msra.mxu1 %v2631_v43  ;;  %v2692_v27 = vld [vmem:[#allocation5 + $0x350] sm:$0xf0]  ;;  %v3464_v28 = vld [vmem:[#allocation5 + $0x444] sm:$0xf]  ;;  %v2567_v31 = vor.u32 %v3400_v23, %v2564_v25 }
  0x60   :  { %1615 = vmatpush.bf16.msra.mxu2 %v2759_v44  ;;  %v2820_v29 = vld [vmem:[#allocation5 + $0x450] sm:$0xf0]  ;;  %v2695_v32 = vor.u32 %v3432_v26, %v2692_v27  ;;  %v3364_v33 = vld [vmem:[#allocation5 + $0x124] sm:$0xf] }
  0x61   :  { %1628 = vmatpush.bf16.msra.mxu3 %v2887_v48  ;;  %v2420_v34 = vld [vmem:[#allocation5 + $0x130] sm:$0xf0]  ;;  %v3396_v35 = vld [vmem:[#allocation5 + $0x224] sm:$0xf]  ;;  %v2823_v36 = vor.u32 %v3464_v28, %v2820_v29  ;;  %v2362_v29 = vld [vmem:[#allocation5 + $0xa8] sm:$0xf] }
  0x62   :  { %1590 = vmatpush.bf16.msra.mxu0 %v2487_v54  ;;  %v2548_v38 = vld [vmem:[#allocation5 + $0x230] sm:$0xf0]  ;;  %v3428_v39 = vld [vmem:[#allocation5 + $0x324] sm:$0xf]  ;;  %v2423_v45 = vor.u32 %v3364_v33, %v2420_v34 }
  0x63   :  { %1603 = vmatpush.bf16.msra.mxu1 %v2615_v55  ;;  %v2676_v42 = vld [vmem:[#allocation5 + $0x330] sm:$0xf0]  ;;  %v3460_v43 = vld [vmem:[#allocation5 + $0x424] sm:$0xf]  ;;  %v2551_v48 = vor.u32 %v3396_v35, %v2548_v38 }
  0x64   :  { %1616 = vmatpush.bf16.msra.mxu2 %v2743_v56  ;;  %v2804_v44 = vld [vmem:[#allocation5 + $0x430] sm:$0xf0]  ;;  %v3360_v46 = vld [vmem:[#allocation5 + $0x104] sm:$0xf]  ;;  %v2679_v49 = vor.u32 %v3428_v39, %v2676_v42 }
  0x65   :  { %1629 = vmatpush.bf16.msra.mxu3 %v2871_v60  ;;  %v2404_v47 = vld [vmem:[#allocation5 + $0x110] sm:$0xf0]  ;;  %v3392_v50 = vld [vmem:[#allocation5 + $0x204] sm:$0xf]  ;;  %v2807_v53 = vor.u32 %v3460_v43, %v2804_v44  ;;  %v2346_v44 = vld [vmem:[#allocation5 + $0x88] sm:$0xf] }
  0x66   :  { %1591 = vmatpush.bf16.msra.mxu0 %v2471_v2  ;;  %v2532_v51 = vld [vmem:[#allocation5 + $0x210] sm:$0xf0]  ;;  %v3424_v52 = vld [vmem:[#allocation5 + $0x304] sm:$0xf]  ;;  %v2407_v60 = vor.u32 %v3360_v46, %v2404_v47  ;;  %v2522_v2 = vld [vmem:[#allocation5 + $0x1e8] sm:$0xf] }
  0x67   :  { %1604 = vmatpush.bf16.msra.mxu1 %v2599_v3  ;;  %v2660_v54 = vld [vmem:[#allocation5 + $0x310] sm:$0xf0]  ;;  %v3456_v55 = vld [vmem:[#allocation5 + $0x404] sm:$0xf]  ;;  %v2535_v0 = vor.u32 %v3392_v50, %v2532_v51  ;;  %v3391_v3 = vld [vmem:[#allocation5 + $0x1f4] sm:$0xf0] }
  0x68   :  { %1617 = vmatpush.bf16.msra.mxu2 %v2727_v4  ;;  %v2788_v56 = vld [vmem:[#allocation5 + $0x410] sm:$0xf0]  ;;  %v3516_v57 = vld [vmem:[#allocation5 + $0x5e4] sm:$0xf]  ;;  %v2663_v1 = vor.u32 %v3424_v52, %v2660_v54  ;;  %v2523_v11 = vor.u32 %v3391_v3, %v2522_v2  ;;  %v2474_v46 = vld [vmem:[#allocation5 + $0x188] sm:$0xf] }
  0x69   :  { %1630 = vmatpush.bf16.msra.mxu3 %v2855_v8  ;;  %v3028_v58 = vld [vmem:[#allocation5 + $0x5f0] sm:$0xf0]  ;;  %v3548_v59 = vld [vmem:[#allocation5 + $0x6e4] sm:$0xf]  ;;  %v2791_v4 = vor.u32 %v3456_v55, %v2788_v56  ;;  %v3379_v47 = vld [vmem:[#allocation5 + $0x194] sm:$0xf0] }
  0x6a   :  { %1592 = vmatpush.bf16.msra.mxu0 %v2455_v14  ;;  %v3156_v61 = vld [vmem:[#allocation5 + $0x6f0] sm:$0xf0]  ;;  %v3031_v5 = vor.u32 %v3516_v57, %v3028_v58  ;;  %v3512_v8 = vld [vmem:[#allocation5 + $0x5c4] sm:$0xf]  ;;  %v3355_v14 = vld [vmem:[#allocation5 + $0xd4] sm:$0xf0]  ;;  %v2475_v54 = vor.u32 %v3379_v47, %v2474_v46 }
  0x6b   :  { %1605 = vmatpush.bf16.msra.mxu1 %v2583_v15  ;;  %v3159_v6 = vor.u32 %v3548_v59, %v3156_v61  ;;  %v3012_v9 = vld [vmem:[#allocation5 + $0x5d0] sm:$0xf0]  ;;  %v3544_v10 = vld [vmem:[#allocation5 + $0x6c4] sm:$0xf]  ;;  %v2506_v15 = vld [vmem:[#allocation5 + $0x1c8] sm:$0xf]  ;;  %v2379_v23 = vor.u32 %v3355_v14, %v2378_v13 }
  0x6c   :  { %1618 = vmatpush.bf16.msra.mxu2 %v2711_v16  ;;  %v3140_v12 = vld [vmem:[#allocation5 + $0x6d0] sm:$0xf0]  ;;  %v3387_v16 = vld [vmem:[#allocation5 + $0x1d4] sm:$0xf0]  ;;  %v3015_v17 = vor.u32 %v3512_v8, %v3012_v9  ;;  %v3540_v26 = vld [vmem:[#allocation5 + $0x6a4] sm:$0xf] }
  0x6d   :  { %1631 = vmatpush.bf16.msra.mxu3 %v2839_v24  ;;  %v3143_v21 = vor.u32 %v3544_v10, %v3140_v12  ;;  %v3508_v24 = vld [vmem:[#allocation5 + $0x5a4] sm:$0xf]  ;;  %v2996_v25 = vld [vmem:[#allocation5 + $0x5b0] sm:$0xf0]  ;;  %v2507_v27 = vor.u32 %v3387_v16, %v2506_v15  ;;  %v2330_v56 = vld [vmem:[#allocation5 + $0x68] sm:$0xf] }
  0x6e   :  { %1593 = vmatpush.bf16.msra.mxu0 %v2439_v30  ;;  %v3124_v28 = vld [vmem:[#allocation5 + $0x6b0] sm:$0xf0]  ;;  %v3351_v30 = vld [vmem:[#allocation5 + $0xb4] sm:$0xf0]  ;;  %v2999_v33 = vor.u32 %v3508_v24, %v2996_v25  ;;  %v3536_v39 = vld [vmem:[#allocation5 + $0x684] sm:$0xf] }
  0x6f   :  { %1606 = vmatpush.bf16.msra.mxu1 %v2567_v31  ;;  %v2490_v31 = vld [vmem:[#allocation5 + $0x1a8] sm:$0xf]  ;;  %v3127_v34 = vor.u32 %v3540_v26, %v3124_v28  ;;  %v2363_v35 = vor.u32 %v3351_v30, %v2362_v29  ;;  %v2980_v38 = vld [vmem:[#allocation5 + $0x590] sm:$0xf0]  ;;  %v3500_v51 = vld [vmem:[#allocation5 + $0x564] sm:$0xf] }
  0x70   :  { %1619 = vmatpush.bf16.msra.mxu2 %v2695_v32  ;;  %v3383_v32 = vld [vmem:[#allocation5 + $0x1b4] sm:$0xf0]  ;;  %v3108_v43 = vld [vmem:[#allocation5 + $0x690] sm:$0xf0]  ;;  %v2458_v58 = vld [vmem:[#allocation5 + $0x168] sm:$0xf] }
  0x71   :  { %1632 = vmatpush.bf16.msra.mxu3 %v2823_v36  ;;  %v3504_v36 = vld [vmem:[#allocation5 + $0x584] sm:$0xf]  ;;  %v2491_v42 = vor.u32 %v3383_v32, %v2490_v31  ;;  %v2964_v52 = vld [vmem:[#allocation5 + $0x570] sm:$0xf0]  ;;  %v3343_v57 = vld [vmem:[#allocation5 + $0x74] sm:$0xf0] }
  0x72   :  { %1594 = vmatpush.bf16.msra.mxu0 %v2423_v45  ;;  %v3347_v45 = vld [vmem:[#allocation5 + $0x94] sm:$0xf0]  ;;  %v3092_v55 = vld [vmem:[#allocation5 + $0x670] sm:$0xf0]  ;;  %v2331_v62 = vor.u32 %v3343_v57, %v2330_v56  ;;  %v3496_v63 = vld [vmem:[#allocation5 + $0x544] sm:$0xf] }
  0x73   :  { %1607 = vmatpush.bf16.msra.mxu1 %v2551_v48  ;;  %v2983_v48 = vor.u32 %v3504_v36, %v2980_v38  ;;  %v2347_v50 = vor.u32 %v3347_v45, %v2346_v44  ;;  %v3375_v59 = vld [vmem:[#allocation5 + $0x174] sm:$0xf0]  ;;  %v3076_v3 = vld [vmem:[#allocation5 + $0x650] sm:$0xf0]  ;;  %v3524_v13 = vld [vmem:[#allocation5 + $0x624] sm:$0xf] }
  0x74   :  { %1620 = vmatpush.bf16.msra.mxu2 %v2679_v49  ;;  %v3111_v49 = vor.u32 %v3536_v39, %v3108_v43  ;;  %v2459_v2 = vor.u32 %v3375_v59, %v2458_v58  ;;  %v2932_v12 = vld [vmem:[#allocation5 + $0x530] sm:$0xf0]  ;;  %v2298_v16 = vld [vmem:[#allocation5 + $0x28] sm:$0xf]  ;;  %v3488_v25 = vld [vmem:[#allocation5 + $0x504] sm:$0xf] }
  0x75   :  { %1633 = vmatpush.bf16.msra.mxu3 %v2807_v53  ;;  %v3532_v53 = vld [vmem:[#allocation5 + $0x664] sm:$0xf]  ;;  %v3060_v15 = vld [vmem:[#allocation5 + $0x630] sm:$0xf0]  ;;  %v2282_v31 = vld [vmem:[#allocation5 + $0x8] sm:$0xf] }
  0x76   :  { %1595 = vmatpush.bf16.msra.mxu0 %v2407_v60  ;;  %v2967_v60 = vor.u32 %v3500_v51, %v2964_v52  ;;  %v3095_v61 = vor.u32 %v3532_v53, %v3092_v55  ;;  %v2916_v26 = vld [vmem:[#allocation5 + $0x510] sm:$0xf0]  ;;  %v3520_v29 = vld [vmem:[#allocation5 + $0x604] sm:$0xf]  ;;  %v2650_v36 = vld [vmem:[#allocation5 + $0x2e8] sm:$0xf] }
  0x77   :  { %1608 = vmatpush.bf16.msra.mxu1 %v2535_v0  ;;  %v2948_v0 = vld [vmem:[#allocation5 + $0x550] sm:$0xf0]  ;;  %v3423_v38 = vld [vmem:[#allocation5 + $0x2f4] sm:$0xf0]  ;;  %v2778_v39 = vld [vmem:[#allocation5 + $0x3e8] sm:$0xf] }
  0x78   :  { %1621 = vmatpush.bf16.msra.mxu2 %v2663_v1  ;;  %v3528_v1 = vld [vmem:[#allocation5 + $0x644] sm:$0xf]  ;;  %v2951_v8 = vor.u32 %v3496_v63, %v2948_v0  ;;  %v3044_v30 = vld [vmem:[#allocation5 + $0x610] sm:$0xf0]  ;;  %v3455_v43 = vld [vmem:[#allocation5 + $0x3f4] sm:$0xf0]  ;;  %v2651_v51 = vor.u32 %v3423_v38, %v2650_v36 }
  0x79   :  { %1634 = vmatpush.bf16.msra.mxu3 %v2791_v4  ;;  %1596 = vmatmul.bf16.vlgmr.msra.gmra.mxu0 %v3827_v22  ;;  %v2314_v4 = vld [vmem:[#allocation5 + $0x48] sm:$0xf]  ;;  %v3079_v9 = vor.u32 %v3528_v1, %v3076_v3  ;;  %v3487_v45 = vld [vmem:[#allocation5 + $0x4f4] sm:$0xf0]  ;;  %v3047_v46 = vor.u32 %v3520_v29, %v3044_v30  ;;  %v2779_v52 = vor.u32 %v3455_v43, %v2778_v39 }
  0x7a   :  { %1640 = vmatpush.bf16.msrb.mxu0 %v3031_v5  ;;  %1609 = vmatmul.bf16.vlgmr.msra.gmra.mxu1 %v3821_v18  ;;  %v3339_v5 = vld [vmem:[#allocation5 + $0x54] sm:$0xf0]  ;;  %v2906_v44 = vld [vmem:[#allocation5 + $0x4e8] sm:$0xf] }
  0x7b   :  { %1653 = vmatpush.bf16.msrb.mxu1 %v3159_v6  ;;  %1622 = vmatmul.bf16.vlgmr.msra.gmra.mxu2 %v3825_v20  ;;  %v2442_v6 = vld [vmem:[#allocation5 + $0x148] sm:$0xf]  ;;  %v2315_v10 = vor.u32 %v3339_v5, %v2314_v4  ;;  %v2907_v53 = vor.u32 %v3487_v45, %v2906_v44  ;;  %v3419_v55 = vld [vmem:[#allocation5 + $0x2d4] sm:$0xf0] }
  0x7c   :  { %1666 = vmatpush.bf16.msrb.mxu2 %v2395_v7  ;;  %1635 = vmatmul.bf16.vlgmr.msra.gmra.mxu3 %v3835_v40  ;;  %v3371_v7 = vld [vmem:[#allocation5 + $0x154] sm:$0xf0]  ;;  %v2762_v56 = vld [vmem:[#allocation5 + $0x3c8] sm:$0xf] }
  0x7d   :  { %1679 = vmatpush.bf16.msrb.mxu3 %v2523_v11  ;;  %v3492_v11 = vld [vmem:[#allocation5 + $0x524] sm:$0xf]  ;;  %v2443_v14 = vor.u32 %v3371_v7, %v2442_v6  ;;  %v3451_v58 = vld [vmem:[#allocation5 + $0x3d4] sm:$0xf0]  ;;  %v2890_v59 = vld [vmem:[#allocation5 + $0x4c8] sm:$0xf] }
  0x7e   :  { %1641 = vmatpush.bf16.msrb.mxu0 %v3015_v17  ;;  %v3335_v17 = vld [vmem:[#allocation5 + $0x34] sm:$0xf0]  ;;  %v2935_v24 = vor.u32 %v3492_v11, %v2932_v12  ;;  %v2763_v0 = vor.u32 %v3451_v58, %v2762_v56  ;;  %v2746_v4 = vld [vmem:[#allocation5 + $0x3a8] sm:$0xf] }
  0x7f   :  { %1654 = vmatpush.bf16.msrb.mxu1 %v3143_v21  ;;  %v2426_v21 = vld [vmem:[#allocation5 + $0x128] sm:$0xf]  ;;  %v2299_v28 = vor.u32 %v3335_v17, %v2298_v16  ;;  %v3415_v3 = vld [vmem:[#allocation5 + $0x2b4] sm:$0xf0] }
  0x80   :  { %1667 = vmatpush.bf16.msrb.mxu2 %v2379_v23  ;;  %v3367_v23 = vld [vmem:[#allocation5 + $0x134] sm:$0xf0]  ;;  %v2874_v7 = vld [vmem:[#allocation5 + $0x4a8] sm:$0xf] }
  0x81   :  { %1680 = vmatpush.bf16.msrb.mxu3 %v2507_v27  ;;  %v3063_v27 = vor.u32 %v3524_v13, %v3060_v15  ;;  %v2427_v32 = vor.u32 %v3367_v23, %v2426_v21  ;;  %v3447_v6 = vld [vmem:[#allocation5 + $0x3b4] sm:$0xf0]  ;;  %v2730_v16 = vld [vmem:[#allocation5 + $0x388] sm:$0xf] }
  0x82   :  { %1642 = vmatpush.bf16.msrb.mxu0 %v2999_v33  ;;  %v3331_v33 = vld [vmem:[#allocation5 + $0x14] sm:$0xf0]  ;;  %v2747_v12 = vor.u32 %v3447_v6, %v2746_v4  ;;  %v2858_v23 = vld [vmem:[#allocation5 + $0x488] sm:$0xf] }
  0x83   :  { %1655 = vmatpush.bf16.msrb.mxu1 %v3127_v34  ;;  %v2410_v34 = vld [vmem:[#allocation5 + $0x108] sm:$0xf]  ;;  %v2283_v47 = vor.u32 %v3331_v33, %v2282_v31  ;;  %v3411_v15 = vld [vmem:[#allocation5 + $0x294] sm:$0xf0] }
  0x84   :  { %1668 = vmatpush.bf16.msrb.mxu2 %v2363_v35  ;;  %v3363_v35 = vld [vmem:[#allocation5 + $0x114] sm:$0xf0]  ;;  %v2586_v30 = vld [vmem:[#allocation5 + $0x268] sm:$0xf] }
  0x85   :  { %1681 = vmatpush.bf16.msrb.mxu3 %v2491_v42  ;;  %v2919_v42 = vor.u32 %v3488_v25, %v2916_v26  ;;  %v3443_v21 = vld [vmem:[#allocation5 + $0x394] sm:$0xf0]  ;;  %v2986_v25 = vld [vmem:[#allocation5 + $0x588] sm:$0xf] }
  0x86   :  { %1643 = vmatpush.bf16.msrb.mxu0 %v2983_v48  ;;  %v3034_v48 = vld [vmem:[#allocation5 + $0x5e8] sm:$0xf]  ;;  %v3507_v26 = vld [vmem:[#allocation5 + $0x594] sm:$0xf0] }
  0x87   :  { %1656 = vmatpush.bf16.msrb.mxu1 %v3111_v49  ;;  %v3519_v49 = vld [vmem:[#allocation5 + $0x5f4] sm:$0xf0]  ;;  %v2987_v33 = vor.u32 %v3507_v26, %v2986_v25  ;;  %v2970_v38 = vld [vmem:[#allocation5 + $0x568] sm:$0xf] }
  0x88   :  { %1669 = vmatpush.bf16.msrb.mxu2 %v2347_v50  ;;  %v2411_v50 = vor.u32 %v3363_v35, %v2410_v34  ;;  %v3035_v57 = vor.u32 %v3519_v49, %v3034_v48  ;;  %v3407_v31 = vld [vmem:[#allocation5 + $0x274] sm:$0xf0]  ;;  %v2842_v35 = vld [vmem:[#allocation5 + $0x468] sm:$0xf] }
  0x89   :  { %1682 = vmatpush.bf16.msrb.mxu3 %v2475_v54  ;;  %v2634_v54 = vld [vmem:[#allocation5 + $0x2c8] sm:$0xf]  ;;  %v3439_v34 = vld [vmem:[#allocation5 + $0x374] sm:$0xf0] }
  0x8a   :  { %1644 = vmatpush.bf16.msrb.mxu0 %v2967_v60  ;;  %v3483_v60 = vld [vmem:[#allocation5 + $0x4d4] sm:$0xf0]  ;;  %v2635_v63 = vor.u32 %v3419_v55, %v2634_v54  ;;  %v2570_v45 = vld [vmem:[#allocation5 + $0x248] sm:$0xf] }
  0x8b   :  { %1657 = vmatpush.bf16.msrb.mxu1 %v3095_v61  ;;  %v3018_v61 = vld [vmem:[#allocation5 + $0x5c8] sm:$0xf]  ;;  %v2891_v1 = vor.u32 %v3483_v60, %v2890_v59  ;;  %v3471_v36 = vld [vmem:[#allocation5 + $0x474] sm:$0xf0] }
  0x8c   :  { %1670 = vmatpush.bf16.msrb.mxu2 %v2331_v62  ;;  %v3515_v62 = vld [vmem:[#allocation5 + $0x5d4] sm:$0xf0]  ;;  %v2843_v44 = vor.u32 %v3471_v36, %v2842_v35  ;;  %v2682_v59 = vld [vmem:[#allocation5 + $0x328] sm:$0xf]  ;;  %v3353_v35 = vld [vmem:[#allocation5 + $0xcc] sm:$0xf] }
  0x8d   :  { %1683 = vmatpush.bf16.msrb.mxu3 %v2459_v2  ;;  %v2618_v2 = vld [vmem:[#allocation5 + $0x2a8] sm:$0xf]  ;;  %v3019_v5 = vor.u32 %v3515_v62, %v3018_v61  ;;  %v3503_v39 = vld [vmem:[#allocation5 + $0x574] sm:$0xf0] }
  0x8e   :  { %1645 = vmatpush.bf16.msrb.mxu0 %v2951_v8  ;;  %v3479_v8 = vld [vmem:[#allocation5 + $0x4b4] sm:$0xf0]  ;;  %v2619_v11 = vor.u32 %v3415_v3, %v2618_v2  ;;  %v2971_v48 = vor.u32 %v3503_v39, %v2970_v38  ;;  %v2810_v62 = vld [vmem:[#allocation5 + $0x428] sm:$0xf]  ;;  %v2380_v38 = vld [vmem:[#allocation5 + $0xd8] sm:$0xf0] }
  0x8f   :  { %1658 = vmatpush.bf16.msrb.mxu1 %v3079_v9  ;;  %v3002_v9 = vld [vmem:[#allocation5 + $0x5a8] sm:$0xf]  ;;  %v2875_v13 = vor.u32 %v3479_v8, %v2874_v7  ;;  %v3435_v49 = vld [vmem:[#allocation5 + $0x354] sm:$0xf0]  ;;  %v3385_v39 = vld [vmem:[#allocation5 + $0x1cc] sm:$0xf] }
  0x90   :  { %1671 = vmatpush.bf16.msrb.mxu2 %v2315_v10  ;;  %v3511_v10 = vld [vmem:[#allocation5 + $0x5b4] sm:$0xf0]  ;;  %v2538_v3 = vld [vmem:[#allocation5 + $0x208] sm:$0xf] }
  0x91   :  { %1684 = vmatpush.bf16.msrb.mxu3 %v2443_v14  ;;  %v2602_v14 = vld [vmem:[#allocation5 + $0x288] sm:$0xf]  ;;  %v3003_v17 = vor.u32 %v3511_v10, %v3002_v9  ;;  %v3399_v58 = vld [vmem:[#allocation5 + $0x234] sm:$0xf0] }
  0x92   :  { %1646 = vmatpush.bf16.msrb.mxu0 %v2935_v24  ;;  %v3475_v24 = vld [vmem:[#allocation5 + $0x494] sm:$0xf0]  ;;  %v2666_v7 = vld [vmem:[#allocation5 + $0x308] sm:$0xf] }
  0x93   :  { %1659 = vmatpush.bf16.msrb.mxu1 %v3063_v27  ;;  %v2603_v27 = vor.u32 %v3411_v15, %v2602_v14  ;;  %v2859_v29 = vor.u32 %v3475_v24, %v2858_v23  ;;  %v3431_v61 = vld [vmem:[#allocation5 + $0x334] sm:$0xf0]  ;;  %v2794_v9 = vld [vmem:[#allocation5 + $0x408] sm:$0xf]  ;;  %v3389_v23 = vld [vmem:[#allocation5 + $0x1ec] sm:$0xf] }
  0x94   :  { %1672 = vmatpush.bf16.msrb.mxu2 %v2299_v28  ;;  %v2731_v28 = vor.u32 %v3443_v21, %v2730_v16  ;;  %v3395_v4 = vld [vmem:[#allocation5 + $0x214] sm:$0xf0]  ;;  %v3162_v14 = vld [vmem:[#allocation5 + $0x6e8] sm:$0xf]  ;;  %v3357_v16 = vld [vmem:[#allocation5 + $0xec] sm:$0xf] }
  0x95   :  { %1685 = vmatpush.bf16.msrb.mxu3 %v2427_v32  ;;  %v2714_v32 = vld [vmem:[#allocation5 + $0x368] sm:$0xf]  ;;  %v3427_v8 = vld [vmem:[#allocation5 + $0x314] sm:$0xf0]  ;;  %v2396_v21 = vld [vmem:[#allocation5 + $0xf8] sm:$0xf0] }
  0x96   :  { %1647 = vmatpush.bf16.msrb.mxu0 %v2919_v42  ;;  %v2587_v42 = vor.u32 %v3407_v31, %v2586_v30  ;;  %v2715_v43 = vor.u32 %v3439_v34, %v2714_v32  ;;  %v3551_v15 = vld [vmem:[#allocation5 + $0x6f4] sm:$0xf0]  ;;  %v2524_v24 = vld [vmem:[#allocation5 + $0x1f8] sm:$0xf0]  ;;  %v2667_v25 = vor.u32 %v3427_v8, %v2666_v7  ;;  %v2399_v31 = vor.u32 %v3357_v16, %v2396_v21  ;;  %v3098_v8 = vld [vmem:[#allocation5 + $0x668] sm:$0xf] }
  0x97   :  { %1660 = vmatpush.bf16.msrb.mxu1 %v3047_v46  ;;  %v3403_v46 = vld [vmem:[#allocation5 + $0x254] sm:$0xf0]  ;;  %v3163_v30 = vor.u32 %v3551_v15, %v3162_v14  ;;  %v2527_v32 = vor.u32 %v3389_v23, %v2524_v24  ;;  %v2460_v14 = vld [vmem:[#allocation5 + $0x178] sm:$0xf0]  ;;  %v3405_v15 = vld [vmem:[#allocation5 + $0x26c] sm:$0xf] }
  0x98   :  { %1673 = vmatpush.bf16.msrb.mxu2 %v2283_v47  ;;  %v2698_v47 = vld [vmem:[#allocation5 + $0x348] sm:$0xf]  ;;  %v2571_v54 = vor.u32 %v3403_v46, %v2570_v45  ;;  %v3547_v34 = vld [vmem:[#allocation5 + $0x6d4] sm:$0xf0]  ;;  %v2383_v46 = vor.u32 %v3353_v35, %v2380_v38  ;;  %v2588_v16 = vld [vmem:[#allocation5 + $0x278] sm:$0xf0] }
  0x99   :  { %1686 = vmatpush.bf16.msrb.mxu3 %v2411_v50  ;;  %1648 = vmatmul.bf16.vlgmr.msrb.gmra.mxu0 %v3837_v41  ;;  %v2826_v50 = vld [vmem:[#allocation5 + $0x448] sm:$0xf]  ;;  %v2699_v55 = vor.u32 %v3435_v49, %v2698_v47  ;;  %v3543_v49 = vld [vmem:[#allocation5 + $0x6b4] sm:$0xf0] }
  0x9a   :  { %1692 = vmatpush.bf16.msra.mxu0 %v2651_v51  ;;  %1661 = vmatmul.bf16.vlgmr.msrb.gmra.mxu1 %v3833_v37  ;;  %v3467_v51 = vld [vmem:[#allocation5 + $0x454] sm:$0xf0]  ;;  %v3082_v24 = vld [vmem:[#allocation5 + $0x648] sm:$0xf] }
  0x9b   :  { %1705 = vmatpush.bf16.msra.mxu1 %v2779_v52  ;;  %1674 = vmatmul.bf16.vlgmr.msrb.gmra.mxu2 %v3823_v19  ;;  %v2954_v52 = vld [vmem:[#allocation5 + $0x548] sm:$0xf]  ;;  %v2827_v56 = vor.u32 %v3467_v51, %v2826_v50  ;;  %v3349_v50 = vld [vmem:[#allocation5 + $0xac] sm:$0xf] }
  0x9c   :  { %1718 = vmatpush.bf16.msra.mxu2 %v2907_v53  ;;  %1687 = vmatmul.bf16.vlgmr.msrb.gmra.mxu3 %v3827_v22  ;;  %v3499_v53 = vld [vmem:[#allocation5 + $0x554] sm:$0xf0]  ;;  %v3066_v38 = vld [vmem:[#allocation5 + $0x628] sm:$0xf] }
  0x9d   :  { %1731 = vmatpush.bf16.msra.mxu3 %v3035_v57  ;;  %v2554_v57 = vld [vmem:[#allocation5 + $0x228] sm:$0xf]  ;;  %v2955_v60 = vor.u32 %v3499_v53, %v2954_v52  ;;  %v2364_v52 = vld [vmem:[#allocation5 + $0xb8] sm:$0xf0]  ;;  %v3381_v53 = vld [vmem:[#allocation5 + $0x1ac] sm:$0xf] }
  0x9e   :  { %1693 = vmatpush.bf16.msra.mxu0 %v2635_v63  ;;  %v3463_v63 = vld [vmem:[#allocation5 + $0x434] sm:$0xf0]  ;;  %v2555_v2 = vor.u32 %v3399_v58, %v2554_v57  ;;  %v2367_v58 = vor.u32 %v3349_v50, %v2364_v52 }
  0x9f   :  { %1706 = vmatpush.bf16.msra.mxu1 %v2763_v0  ;;  %v2938_v0 = vld [vmem:[#allocation5 + $0x528] sm:$0xf]  ;;  %v2811_v6 = vor.u32 %v3463_v63, %v2810_v62  ;;  %v3345_v62 = vld [vmem:[#allocation5 + $0x8c] sm:$0xf]  ;;  %v3523_v52 = vld [vmem:[#allocation5 + $0x614] sm:$0xf0] }
  0xa0   :  { %1719 = vmatpush.bf16.msra.mxu2 %v2891_v1  ;;  %v3495_v1 = vld [vmem:[#allocation5 + $0x534] sm:$0xf0] }
  0xa1   :  { %1732 = vmatpush.bf16.msra.mxu3 %v3019_v5  ;;  %v2683_v5 = vor.u32 %v3431_v61, %v2682_v59  ;;  %v2939_v10 = vor.u32 %v3495_v1, %v2938_v0  ;;  %v3539_v61 = vld [vmem:[#allocation5 + $0x694] sm:$0xf0]  ;;  %v2348_v0 = vld [vmem:[#allocation5 + $0x98] sm:$0xf0]  ;;  %v3377_v1 = vld [vmem:[#allocation5 + $0x18c] sm:$0xf] }
  0xa2   :  { %1694 = vmatpush.bf16.msra.mxu0 %v2619_v11  ;;  %v3459_v11 = vld [vmem:[#allocation5 + $0x414] sm:$0xf0] }
  0xa3   :  { %1707 = vmatpush.bf16.msra.mxu1 %v2747_v12  ;;  %v2922_v12 = vld [vmem:[#allocation5 + $0x508] sm:$0xf]  ;;  %v2795_v26 = vor.u32 %v3459_v11, %v2794_v9  ;;  %v3535_v9 = vld [vmem:[#allocation5 + $0x674] sm:$0xf0] }
  0xa4   :  { %1720 = vmatpush.bf16.msra.mxu2 %v2875_v13  ;;  %v3491_v13 = vld [vmem:[#allocation5 + $0x514] sm:$0xf0] }
  0xa5   :  { %1733 = vmatpush.bf16.msra.mxu3 %v3003_v17  ;;  %v2539_v17 = vor.u32 %v3395_v4, %v2538_v3  ;;  %v3409_v3 = vld [vmem:[#allocation5 + $0x28c] sm:$0xf]  ;;  %v2604_v4 = vld [vmem:[#allocation5 + $0x298] sm:$0xf0] }
  0xa6   :  { %1695 = vmatpush.bf16.msra.mxu0 %v2603_v27  ;;  %v3421_v27 = vld [vmem:[#allocation5 + $0x2ec] sm:$0xf]  ;;  %v2607_v11 = vor.u32 %v3409_v3, %v2604_v4  ;;  %v2908_v4 = vld [vmem:[#allocation5 + $0x4f8] sm:$0xf0] }
  0xa7   :  { %1708 = vmatpush.bf16.msra.mxu1 %v2731_v28  ;;  %v2652_v28 = vld [vmem:[#allocation5 + $0x2f8] sm:$0xf0] }
  0xa8   :  { %1721 = vmatpush.bf16.msra.mxu2 %v2859_v29  ;;  %v2923_v29 = vor.u32 %v3491_v13, %v2922_v12  ;;  %v2655_v36 = vor.u32 %v3421_v27, %v2652_v28  ;;  %v2332_v12 = vld [vmem:[#allocation5 + $0x78] sm:$0xf0]  ;;  %v3373_v13 = vld [vmem:[#allocation5 + $0x16c] sm:$0xf]  ;;  %v2591_v27 = vor.u32 %v3405_v15, %v2588_v16 }
  0xa9   :  { %1734 = vmatpush.bf16.msra.mxu3 %v2987_v33  ;;  %v3146_v33 = vld [vmem:[#allocation5 + $0x6c8] sm:$0xf]  ;;  %v2463_v23 = vor.u32 %v3373_v13, %v2460_v14  ;;  %v2316_v28 = vld [vmem:[#allocation5 + $0x58] sm:$0xf0] }
  0xaa   :  { %1696 = vmatpush.bf16.msra.mxu0 %v2587_v42  ;;  %v2508_v42 = vld [vmem:[#allocation5 + $0x1d8] sm:$0xf0]  ;;  %v3147_v45 = vor.u32 %v3547_v34, %v3146_v33 }
  0xab   :  { %1709 = vmatpush.bf16.msra.mxu1 %v2715_v43  ;;  %v3417_v43 = vld [vmem:[#allocation5 + $0x2cc] sm:$0xf]  ;;  %v2511_v47 = vor.u32 %v3385_v39, %v2508_v42  ;;  %v3527_v39 = vld [vmem:[#allocation5 + $0x634] sm:$0xf0] }
  0xac   :  { %1722 = vmatpush.bf16.msra.mxu2 %v2843_v44  ;;  %v2636_v44 = vld [vmem:[#allocation5 + $0x2d8] sm:$0xf0]  ;;  %v3333_v42 = vld [vmem:[#allocation5 + $0x2c] sm:$0xf]  ;;  %v3067_v50 = vor.u32 %v3527_v39, %v3066_v38 }
  0xad   :  { %1735 = vmatpush.bf16.msra.mxu3 %v2971_v48  ;;  %v3130_v48 = vld [vmem:[#allocation5 + $0x6a8] sm:$0xf]  ;;  %v2639_v51 = vor.u32 %v3417_v43, %v2636_v44  ;;  %v2748_v38 = vld [vmem:[#allocation5 + $0x3b8] sm:$0xf0]  ;;  %v3477_v39 = vld [vmem:[#allocation5 + $0x4ac] sm:$0xf] }
  0xae   :  { %1697 = vmatpush.bf16.msra.mxu0 %v2571_v54  ;;  %v2492_v54 = vld [vmem:[#allocation5 + $0x1b8] sm:$0xf0]  ;;  %v3131_v57 = vor.u32 %v3543_v49, %v3130_v48  ;;  %v3397_v48 = vld [vmem:[#allocation5 + $0x22c] sm:$0xf] }
  0xaf   :  { %1710 = vmatpush.bf16.msra.mxu1 %v2699_v55  ;;  %v3413_v55 = vld [vmem:[#allocation5 + $0x2ac] sm:$0xf]  ;;  %v2495_v59 = vor.u32 %v3381_v53, %v2492_v54  ;;  %v2556_v49 = vld [vmem:[#allocation5 + $0x238] sm:$0xf0] }
  0xb0   :  { %1723 = vmatpush.bf16.msra.mxu2 %v2827_v56  ;;  %v2620_v56 = vld [vmem:[#allocation5 + $0x2b8] sm:$0xf0] }
  0xb1   :  { %1736 = vmatpush.bf16.msra.mxu3 %v2955_v60  ;;  %v3114_v60 = vld [vmem:[#allocation5 + $0x688] sm:$0xf]  ;;  %v2623_v63 = vor.u32 %v3413_v55, %v2620_v56  ;;  %v3329_v55 = vld [vmem:[#allocation5 + $0xc] sm:$0xf]  ;;  %v2284_v56 = vld [vmem:[#allocation5 + $0x18] sm:$0xf0] }
  0xb2   :  { %1698 = vmatpush.bf16.msra.mxu0 %v2555_v2  ;;  %v2476_v2 = vld [vmem:[#allocation5 + $0x198] sm:$0xf0] }
  0xb3   :  { %1711 = vmatpush.bf16.msra.mxu1 %v2683_v5  ;;  %v3115_v5 = vor.u32 %v3539_v61, %v3114_v60  ;;  %v2479_v7 = vor.u32 %v3377_v1, %v2476_v2  ;;  %v2412_v60 = vld [vmem:[#allocation5 + $0x118] sm:$0xf0]  ;;  %v3393_v61 = vld [vmem:[#allocation5 + $0x20c] sm:$0xf] }
  0xb4   :  { %1724 = vmatpush.bf16.msra.mxu2 %v2811_v6  ;;  %v2351_v6 = vor.u32 %v3345_v62, %v2348_v0  ;;  %v2540_v62 = vld [vmem:[#allocation5 + $0x218] sm:$0xf0]  ;;  %v3453_v0 = vld [vmem:[#allocation5 + $0x3ec] sm:$0xf] }
  0xb5   :  { %1737 = vmatpush.bf16.msra.mxu3 %v2939_v10  ;;  %v3341_v10 = vld [vmem:[#allocation5 + $0x6c] sm:$0xf]  ;;  %v2780_v1 = vld [vmem:[#allocation5 + $0x3f8] sm:$0xf0]  ;;  %v2543_v13 = vor.u32 %v3393_v61, %v2540_v62 }
  0xb6   :  { %1699 = vmatpush.bf16.msra.mxu0 %v2539_v17  ;;  %v3099_v17 = vor.u32 %v3535_v9, %v3098_v8  ;;  %v2335_v21 = vor.u32 %v3341_v10, %v2332_v12  ;;  %v3855_v34 = vpop.f32.mrf.mxu0  ;;  %v3485_v2 = vld [vmem:[#allocation5 + $0x4ec] sm:$0xf]  ;;  %v2287_v8 = vor.u32 %v3329_v55, %v2284_v56  ;;  %v2783_v14 = vor.u32 %v3453_v0, %v2780_v1  ;;  %v2860_v56 = vld [vmem:[#allocation5 + $0x498] sm:$0xf0] }
  0xb7   :  { %1712 = vmatpush.bf16.msra.mxu1 %v2667_v25  ;;  %v3531_v25 = vld [vmem:[#allocation5 + $0x654] sm:$0xf0]  ;;  %v3857_v43 = vpop.f32.mrf.mxu1  ;;  %v3549_v10 = vld [vmem:[#allocation5 + $0x6ec] sm:$0xf]  ;;  %v2911_v15 = vor.u32 %v3485_v2, %v2908_v4  ;;  %v2716_v2 = vld [vmem:[#allocation5 + $0x378] sm:$0xf0] }
  0xb8   :  { %1725 = vmatpush.bf16.msra.mxu2 %v2795_v26  ;;  %v3337_v26 = vld [vmem:[#allocation5 + $0x4c] sm:$0xf]  ;;  %v3083_v33 = vor.u32 %v3531_v25, %v3082_v24  ;;  %v2892_v25 = vld [vmem:[#allocation5 + $0x4d8] sm:$0xf0] }
  0xb9   :  { %1738 = vmatpush.bf16.msra.mxu3 %v2923_v29  ;;  %1700 = vmatmul.bf16.vlgmr.msra.gmra.mxu0 %v3821_v18  ;;  %v3369_v29 = vld [vmem:[#allocation5 + $0x14c] sm:$0xf]  ;;  %v2319_v35 = vor.u32 %v3337_v26, %v2316_v28 }
  0xba   :  { %1744 = vmatpush.bf16.msrb.mxu0 %v3163_v30  ;;  %1713 = vmatmul.bf16.vlgmr.msra.gmra.mxu1 %v3825_v20  ;;  %v2444_v30 = vld [vmem:[#allocation5 + $0x158] sm:$0xf0]  ;;  %v3513_v26 = vld [vmem:[#allocation5 + $0x5cc] sm:$0xf] }
  0xbb   :  { %1757 = vmatpush.bf16.msrb.mxu1 %v2399_v31  ;;  %1726 = vmatmul.bf16.vlgmr.msra.gmra.mxu2 %v3835_v40  ;;  %v3401_v31 = vld [vmem:[#allocation5 + $0x24c] sm:$0xf] }
  0xbc   :  { %1770 = vmatpush.bf16.msrb.mxu2 %v2527_v32  ;;  %1739 = vmatmul.bf16.vlgmr.msra.gmra.mxu3 %v3837_v41  ;;  %v2572_v32 = vld [vmem:[#allocation5 + $0x258] sm:$0xf0]  ;;  %v3545_v28 = vld [vmem:[#allocation5 + $0x6cc] sm:$0xf] }
  0xbd   :  { %1783 = vmatpush.bf16.msrb.mxu3 %v2655_v36  ;;  %v2447_v36 = vor.u32 %v3369_v29, %v2444_v30  ;;  %v2575_v44 = vor.u32 %v3401_v31, %v2572_v32  ;;  %v3148_v29 = vld [vmem:[#allocation5 + $0x6d8] sm:$0xf0]  ;;  %v3437_v1 = vld [vmem:[#allocation5 + $0x36c] sm:$0xf] }
  0xbe   :  { %1745 = vmatpush.bf16.msrb.mxu0 %v3147_v45  ;;  %v2300_v45 = vld [vmem:[#allocation5 + $0x38] sm:$0xf0] }
  0xbf   :  { %1758 = vmatpush.bf16.msrb.mxu1 %v2383_v46  ;;  %v3365_v46 = vld [vmem:[#allocation5 + $0x12c] sm:$0xf]  ;;  %v2303_v53 = vor.u32 %v3333_v42, %v2300_v45  ;;  %v1508_v12 = vpop.f32.mrf.mxu1  ;;  %v3151_v42 = vor.u32 %v3545_v28, %v3148_v29 }
  0xc0   :  { %1771 = vmatpush.bf16.msrb.mxu2 %v2511_v47  ;;  %v2428_v47 = vld [vmem:[#allocation5 + $0x138] sm:$0xf0]  ;;  %v3509_v45 = vld [vmem:[#allocation5 + $0x5ac] sm:$0xf] }
  0xc1   :  { %1784 = vmatpush.bf16.msrb.mxu3 %v2639_v51  ;;  %v3050_v51 = vld [vmem:[#allocation5 + $0x608] sm:$0xf]  ;;  %v2431_v54 = vor.u32 %v3365_v46, %v2428_v47  ;;  %v3004_v46 = vld [vmem:[#allocation5 + $0x5b8] sm:$0xf0]  ;;  %v3541_v47 = vld [vmem:[#allocation5 + $0x6ac] sm:$0xf] }
  0xc2   :  { %1746 = vmatpush.bf16.msrb.mxu0 %v3131_v57  ;;  %v3361_v57 = vld [vmem:[#allocation5 + $0x10c] sm:$0xf]  ;;  %v3051_v3 = vor.u32 %v3523_v52, %v3050_v51  ;;  %v3007_v51 = vor.u32 %v3509_v45, %v3004_v46  ;;  %v3068_v46 = vld [vmem:[#allocation5 + $0x638] sm:$0xf0] }
  0xc3   :  { %1759 = vmatpush.bf16.msrb.mxu1 %v2367_v58  ;;  %v2415_v9 = vor.u32 %v3361_v57, %v2412_v60  ;;  %v3441_v52 = vld [vmem:[#allocation5 + $0x38c] sm:$0xf]  ;;  %v3116_v60 = vld [vmem:[#allocation5 + $0x698] sm:$0xf0] }
  0xc4   :  { %1772 = vmatpush.bf16.msrb.mxu2 %v2495_v59  ;;  %v2559_v59 = vor.u32 %v3397_v48, %v2556_v49  ;;  %v3132_v48 = vld [vmem:[#allocation5 + $0x6b8] sm:$0xf0]  ;;  %v3505_v57 = vld [vmem:[#allocation5 + $0x58c] sm:$0xf] }
  0xc5   :  { %1785 = vmatpush.bf16.msrb.mxu3 %v2623_v63  ;;  %v3135_v55 = vor.u32 %v3541_v47, %v3132_v48  ;;  %v3525_v45 = vld [vmem:[#allocation5 + $0x62c] sm:$0xf]  ;;  %v3875_v47 = vld [vmem:[#allocation7] sm:$0xf] }
  0xc6   :  { %1747 = vmatpush.bf16.msrb.mxu0 %v3115_v5  ;;  %v3517_v5 = vld [vmem:[#allocation5 + $0x5ec] sm:$0xf] }
  0xc7   :  { %1760 = vmatpush.bf16.msrb.mxu1 %v2351_v6  ;;  %v3036_v6 = vld [vmem:[#allocation5 + $0x5f8] sm:$0xf0] }
  0xc8   :  { %1773 = vmatpush.bf16.msrb.mxu2 %v2479_v7  ;;  %v3859_v58 = vpop.f32.mrf.mxu2  ;;  %v1495_v7 = vpop.f32.mrf.mxu0  ;;  %v3039_v16 = vor.u32 %v3517_v5, %v3036_v6  ;;  %v2844_v5 = vld [vmem:[#allocation5 + $0x478] sm:$0xf0]  ;;  %v3501_v6 = vld [vmem:[#allocation5 + $0x56c] sm:$0xf] }
  0xc9   :  { %1786 = vmatpush.bf16.msrb.mxu3 %v2607_v11  ;;  %v3861_v63 = vpop.f32.mrf.mxu3  ;;  %v3164_v11 = vld [vmem:[#allocation5 + $0x6f8] sm:$0xf0] }
  0xca   :  { %1748 = vmatpush.bf16.msrb.mxu0 %v3099_v17  ;;  %v3449_v17 = vld [vmem:[#allocation5 + $0x3cc] sm:$0xf]  ;;  %v3167_v24 = vor.u32 %v3549_v10, %v3164_v11  ;;  %v2972_v7 = vld [vmem:[#allocation5 + $0x578] sm:$0xf0]  ;;  %v2719_v10 = vor.u32 %v3437_v1, %v2716_v2 }
  0xcb   :  { %1761 = vmatpush.bf16.msrb.mxu1 %v2335_v21  ;;  %v2764_v21 = vld [vmem:[#allocation5 + $0x3d8] sm:$0xf0]  ;;  %v2975_v12 = vor.u32 %v3501_v6, %v2972_v7  ;;  %v3558_v7 = vld [vmem:[#allocation8 + $0x30] sm:$0xff] }
  0xcc   :  { %1774 = vmatpush.bf16.msrb.mxu2 %v2463_v23  ;;  %v3481_v23 = vld [vmem:[#allocation5 + $0x4cc] sm:$0xf]  ;;  %v2767_v31 = vor.u32 %v3449_v17, %v2764_v21  ;;  %v2828_v21 = vld [vmem:[#allocation5 + $0x458] sm:$0xf0] }
  0xcd   :  { %1787 = vmatpush.bf16.msrb.mxu3 %v2591_v27  ;;  %v3020_v27 = vld [vmem:[#allocation5 + $0x5d8] sm:$0xf0] }
  0xce   :  { %1749 = vmatpush.bf16.msrb.mxu0 %v3083_v33  ;;  %v2895_v33 = vor.u32 %v3481_v23, %v2892_v25  ;;  %v3497_v23 = vld [vmem:[#allocation5 + $0x54c] sm:$0xf]  ;;  %v3567_v6 = vld [vmem:[#allocation8 + $0x78] sm:$0xff] }
  0xcf   :  { %1762 = vmatpush.bf16.msrb.mxu1 %v2319_v35  ;;  %v3023_v35 = vor.u32 %v3513_v26, %v3020_v27  ;;  %v3529_v25 = vld [vmem:[#allocation5 + $0x64c] sm:$0xf]  ;;  %v3084_v26 = vld [vmem:[#allocation5 + $0x658] sm:$0xf0] }
  0xd0   :  { %1775 = vmatpush.bf16.msrb.mxu2 %v2447_v36  ;;  %v1521_v30 = vpop.f32.mrf.mxu2  ;;  %v3445_v36 = vld [vmem:[#allocation5 + $0x3ac] sm:$0xf] }
  0xd1   :  { %1788 = vmatpush.bf16.msrb.mxu3 %v2575_v44  ;;  %v1534_v32 = vpop.f32.mrf.mxu3  ;;  %v2876_v44 = vld [vmem:[#allocation5 + $0x4b8] sm:$0xf0]  ;;  %v2751_v49 = vor.u32 %v3445_v36, %v2748_v38  ;;  %v3461_v36 = vld [vmem:[#allocation5 + $0x42c] sm:$0xf]  ;;  %v3087_v38 = vor.u32 %v3529_v25, %v3084_v26 }
  0xd2   :  { %1750 = vmatpush.bf16.msrb.mxu0 %v3067_v50  ;;  %v2879_v50 = vor.u32 %v3477_v39, %v2876_v44  ;;  %v2812_v39 = vld [vmem:[#allocation5 + $0x438] sm:$0xf0] }
  0xd3   :  { %1763 = vmatpush.bf16.msrb.mxu1 %v2303_v53  ;;  %v2732_v53 = vld [vmem:[#allocation5 + $0x398] sm:$0xf0] }
  0xd4   :  { %1776 = vmatpush.bf16.msrb.mxu2 %v2431_v54  ;;  %v3473_v54 = vld [vmem:[#allocation5 + $0x48c] sm:$0xf]  ;;  %v2940_v44 = vld [vmem:[#allocation5 + $0x538] sm:$0xf0] }
  0xd5   :  { %1789 = vmatpush.bf16.msrb.mxu3 %v2559_v59  ;;  %v3537_v59 = vld [vmem:[#allocation5 + $0x68c] sm:$0xf] }
  0xd6   :  { %1751 = vmatpush.bf16.msrb.mxu0 %v3051_v3  ;;  %v3867_v61 = vpop.f32.mrf.mxu0  ;;  %v3469_v3 = vld [vmem:[#allocation5 + $0x46c] sm:$0xf]  ;;  %v3119_v4 = vor.u32 %v3537_v59, %v3116_v60  ;;  %v331_v59 = vperm.slane %v3875_v47, 0 }
  0xd7   :  { %1764 = vmatpush.bf16.msrb.mxu1 %v2287_v8  ;;  %v3869_v62 = vpop.f32.mrf.mxu1  ;;  %v3533_v8 = vld [vmem:[#allocation5 + $0x66c] sm:$0xf]  ;;  %v2847_v11 = vor.u32 %v3469_v3, %v2844_v5 }
  0xd8   :  { %1777 = vmatpush.bf16.msrb.mxu2 %v2415_v9  ;;  %v3100_v9 = vld [vmem:[#allocation5 + $0x678] sm:$0xf0]  ;;  %v3521_v60 = vld [vmem:[#allocation5 + $0x60c] sm:$0xf]  ;;  %v1494_v5 = vadd.f32 %v3855_v34, %v331_v59  ;;  %v3570_v59 = vld [vmem:[#allocation8 + $0x90] sm:$0xff] }
  0xd9   :  { %1790 = vmatpush.bf16.msrb.mxu3 %v2543_v13  ;;  %1752 = vmatmul.bf16.vlgmr.msrb.gmra.mxu0 %v3833_v37  ;;  %v3433_v13 = vld [vmem:[#allocation5 + $0x34c] sm:$0xf]  ;;  %v3103_v17 = vor.u32 %v3533_v8, %v3100_v9  ;;  %v3566_v9 = vld [vmem:[#allocation8 + $0x70] sm:$0xff] }
  0xda   :  { %1796 = vmatpush.bf16.msra.mxu0 %v2783_v14  ;;  %1765 = vmatmul.bf16.vlgmr.msrb.gmra.mxu1 %v3823_v19  ;;  %v2863_v19 = vor.u32 %v3473_v54, %v2860_v56  ;;  %v2700_v14 = vld [vmem:[#allocation5 + $0x358] sm:$0xf0]  ;;  %v1507_v8 = vadd.f32 %v3857_v43, %v1494_v5  ;;  %v3557_v34 = vld [vmem:[#allocation8 + $0x28] sm:$0xff] }
  0xdb   :  { %1809 = vmatpush.bf16.msra.mxu1 %v2911_v15  ;;  %1778 = vmatmul.bf16.vlgmr.msrb.gmra.mxu2 %v3827_v22  ;;  %v2988_v22 = vld [vmem:[#allocation5 + $0x598] sm:$0xf0]  ;;  %v3465_v15 = vld [vmem:[#allocation5 + $0x44c] sm:$0xf]  ;;  %v2703_v28 = vor.u32 %v3433_v13, %v2700_v14  ;;  %v3564_v14 = vld [vmem:[#allocation8 + $0x60] sm:$0xff] }
  0xdc   :  { %1822 = vmatpush.bf16.msra.mxu2 %v3039_v16  ;;  %1791 = vmatmul.bf16.vlgmr.msrb.gmra.mxu3 %v3821_v18  ;;  %v2735_v18 = vor.u32 %v3441_v52, %v2732_v53  ;;  %v2991_v0 = vor.u32 %v3505_v57, %v2988_v22  ;;  %v2668_v52 = vld [vmem:[#allocation5 + $0x318] sm:$0xf0]  ;;  %v3457_v53 = vld [vmem:[#allocation5 + $0x40c] sm:$0xf] }
  0xdd   :  { %1835 = vmatpush.bf16.msra.mxu3 %v3167_v24  ;;  %v2956_v24 = vld [vmem:[#allocation5 + $0x558] sm:$0xf0]  ;;  %v3489_v57 = vld [vmem:[#allocation5 + $0x50c] sm:$0xf] }
  0xde   :  { %1797 = vmatpush.bf16.msra.mxu0 %v2767_v31  ;;  %v3871_v16 = vpop.f32.mrf.mxu2  ;;  %v1547_v29 = vpop.f32.mrf.mxu0  ;;  %v2831_v31 = vor.u32 %v3465_v15, %v2828_v21  ;;  %v2959_v32 = vor.u32 %v3497_v23, %v2956_v24  ;;  %v2796_v56 = vld [vmem:[#allocation5 + $0x418] sm:$0xf0]  ;;  %v3554_v21 = vld [vmem:[#allocation8 + $0x10] sm:$0xff] }
  0xdf   :  { %1810 = vmatpush.bf16.msra.mxu1 %v2895_v33  ;;  %v3873_v27 = vpop.f32.mrf.mxu3  ;;  %v1560_v30 = vpop.f32.mrf.mxu1  ;;  %v3429_v33 = vld [vmem:[#allocation5 + $0x32c] sm:$0xf]  ;;  %v2924_v22 = vld [vmem:[#allocation5 + $0x518] sm:$0xf0]  ;;  %v2799_v1 = vor.u32 %v3457_v53, %v2796_v56  ;;  %v3572_v53 = vld [vmem:[#allocation8 + $0xa0] sm:$0xff] }
  0xe0   :  { %1823 = vmatpush.bf16.msra.mxu2 %v3023_v35  ;;  %v2684_v35 = vld [vmem:[#allocation5 + $0x338] sm:$0xf0]  ;;  %v2927_v2 = vor.u32 %v3489_v57, %v2924_v22  ;;  %v3561_v30 = vld [vmem:[#allocation8 + $0x48] sm:$0xff] }
  0xe1   :  { %1836 = vmatpush.bf16.msra.mxu3 %v3151_v42  ;;  %v3493_v42 = vld [vmem:[#allocation5 + $0x52c] sm:$0xf]  ;;  %v2687_v48 = vor.u32 %v3429_v33, %v2684_v35  ;;  %v3575_v29 = vld [vmem:[#allocation8 + $0xb8] sm:$0xff]  ;;  %v3552_v35 = vld [vmem:[#allocation8] sm:$0xff] }
  0xe2   :  { %1798 = vmatpush.bf16.msra.mxu0 %v2751_v49  ;;  %v2815_v49 = vor.u32 %v3461_v36, %v2812_v39  ;;  %v3571_v57 = vld [vmem:[#allocation8 + $0x98] sm:$0xff] }
  0xe3   :  { %1811 = vmatpush.bf16.msra.mxu1 %v2879_v50  ;;  %v2943_v50 = vor.u32 %v3493_v42, %v2940_v44  ;;  %v3583_v5 = vld [vmem:[#allocation8 + $0xf8] sm:$0xff] }
  0xe4   :  { %1824 = vmatpush.bf16.msra.mxu2 %v3007_v51  ;;  %v3425_v51 = vld [vmem:[#allocation5 + $0x30c] sm:$0xf] }
  0xe5   :  { %1837 = vmatpush.bf16.msra.mxu3 %v3135_v55  ;;  %v3071_v55 = vor.u32 %v3525_v45, %v3068_v46 }
  0xe6   :  { %1799 = vmatpush.bf16.msra.mxu0 %v2735_v18  ;;  %v1573_v54 = vpop.f32.mrf.mxu2  ;;  %v3052_v18 = vld [vmem:[#allocation5 + $0x618] sm:$0xf0] }
  0xe7   :  { %1812 = vmatpush.bf16.msra.mxu1 %v2863_v19  ;;  %v1586_v19 = vpop.f32.mrf.mxu3  ;;  %v3055_v3 = vor.u32 %v3521_v60, %v3052_v18  ;;  %v3569_v18 = vld [vmem:[#allocation8 + $0x88] sm:$0xff] }
  0xe8   :  { %1825 = vmatpush.bf16.msra.mxu2 %v2991_v0  ;;  %v2671_v0 = vor.u32 %v3425_v51, %v2668_v52 }
  0xe9   :  { %1838 = vmatpush.bf16.msra.mxu3 %v3119_v4  ;;  %v3559_v4 = vld [vmem:[#allocation8 + $0x38] sm:$0xff] }
  0xea   :  { %1800 = vmatpush.bf16.msra.mxu0 %v2719_v10  ;;  %v1520_v10 = vadd.f32 %v3859_v58, %v1507_v8  ;;  %v332_v58 = vperm.slane %v3875_v47, 1 }
  0xeb   :  { %1813 = vmatpush.bf16.msra.mxu1 %v2847_v11  ;;  %v3565_v11 = vld [vmem:[#allocation8 + $0x68] sm:$0xff] }
  0xec   :  { %1826 = vmatpush.bf16.msra.mxu2 %v2975_v12  ;;  %v3556_v12 = vld [vmem:[#allocation8 + $0x20] sm:$0xff]  ;;  %v1533_v43 = vadd.f32 %v3861_v63, %v1520_v10  ;;  %v3562_v63 = vld [vmem:[#allocation8 + $0x50] sm:$0xff]  ;;  %v1585_v26 = vadd.f32 %v3873_v27, %v332_v58 }
  0xed   :  { %1839 = vmatpush.bf16.msra.mxu3 %v3103_v17 }
  0xee   :  { %1801 = vmatpush.bf16.msra.mxu0 %v2703_v28  ;;  %v3553_v28 = vld [vmem:[#allocation8 + $0x8] sm:$0xff] }
  0xef   :  { %1814 = vmatpush.bf16.msra.mxu1 %v2831_v31 }
  0xf0   :  { %1827 = vmatpush.bf16.msra.mxu2 %v2959_v32 }
  0xf1   :  { %1840 = vmatpush.bf16.msra.mxu3 %v3087_v38 }
  0xf2   :  { %1802 = vmatpush.bf16.msra.mxu0 %v2687_v48 }
  0xf3   :  { %1815 = vmatpush.bf16.msra.mxu1 %v2815_v49 }
  0xf4   :  { %1828 = vmatpush.bf16.msra.mxu2 %v2943_v50  ;;  %v3573_v50 = vld [vmem:[#allocation8 + $0xa8] sm:$0xff] }
  0xf5   :  { %1841 = vmatpush.bf16.msra.mxu3 %v3071_v55 }
  0xf6   :  { %1803 = vmatpush.bf16.msra.mxu0 %v2671_v0  ;;  %v1597_v13 = vpop.f32.mrf.mxu0 }
  0xf7   :  { %1816 = vmatpush.bf16.msra.mxu1 %v2799_v1  ;;  %v1598_v33 = vadd.f32 %v1597_v13, %v1585_v26  ;;  %v3568_v1 = vld [vmem:[#allocation8 + $0x80] sm:$0xff] }
  0xf8   :  { %1829 = vmatpush.bf16.msra.mxu2 %v2927_v2  ;;  %v333_v2 = vperm.slane %v3875_v47, 2 }
  0xf9   :  { %1842 = vmatpush.bf16.msra.mxu3 %v3055_v3  ;;  %1804 = vmatmul.bf16.vlgmr.msra.gmra.mxu0 %v3825_v20  ;;  %v1610_v20 = vpop.f32.mrf.mxu1 }
  0xfa   :  { %2116 = vmatpush.bf16.msrb.mxu0 %v3559_v4  ;;  %1817 = vmatmul.bf16.vlgmr.msra.gmra.mxu1 %v3835_v40  ;;  %v3555_v40 = vld [vmem:[#allocation8 + $0x18] sm:$0xff]  ;;  %v1611_v38 = vadd.f32 %v1610_v20, %v1598_v33 }
  0xfb   :  { %2129 = vmatpush.bf16.msrb.mxu1 %v3567_v6  ;;  %1830 = vmatmul.bf16.vlgmr.msra.gmra.mxu2 %v3837_v41  ;;  %v1546_v41 = vadd.f32 %v3867_v61, %v1533_v43  ;;  %v3580_v43 = vld [vmem:[#allocation8 + $0xe0] sm:$0xff] }
  0xfc   :  { %1843 = vmatmul.bf16.vlgmr.msra.gmra.mxu3 %v3833_v37  ;;  %v3563_v37 = vld [vmem:[#allocation8 + $0x58] sm:$0xff]  ;;  %2142 = vmatpush.bf16.msrb.mxu2 %v3575_v29 }
  0xfd   :  { %v1559_v24 = vadd.f32 %v3869_v62, %v1546_v41  ;;  %v3560_v62 = vld [vmem:[#allocation8 + $0x40] sm:$0xff]  ;;  %2155 = vmatpush.bf16.msrb.mxu3 %v3583_v5 }
  0xfe   :  { %2117 = vmatpush.bf16.msrb.mxu0 %v3558_v7  ;;  %v1623_v15 = vpop.f32.mrf.mxu2  ;;  %v1599_v23 = vpop.f32.mrf.mxu0 }
  0xff   :  { %2130 = vmatpush.bf16.msrb.mxu1 %v3566_v9  ;;  %v1636_v17 = vpop.f32.mrf.mxu3  ;;  %v1572_v61 = vadd.f32 %v3871_v16, %v1559_v24  ;;  %v1624_v27 = vadd.f32 %v1623_v15, %v1611_v38  ;;  %v3574_v16 = vld [vmem:[#allocation8 + $0xb0] sm:$0xff]  ;;  %v3577_v24 = vld [vmem:[#allocation8 + $0xc8] sm:$0xff] }
 0x100   :  { %2143 = vmatpush.bf16.msrb.mxu2 %v3574_v16  ;;  %v3582_v9 = vld [vmem:[#allocation8 + $0xf0] sm:$0xff] }
 0x101   :  { %v1612_v25 = vpop.f32.mrf.mxu1  ;;  %v1848_v36 = vmax.f32 %v1572_v61, 0.0  ;;  %v1637_v42 = vadd.f32 %v1636_v17, %v1624_v27  ;;  %2156 = vmatpush.bf16.msrb.mxu3 %v3582_v9 }
 0x102   :  { %2118 = vmatpush.bf16.msrb.mxu0 %v3557_v34 }
 0x103   :  { %2131 = vmatpush.bf16.msrb.mxu1 %v3565_v11  ;;  %v1852_v39 = vpack.c.bf16 %v1848_v36, %v1848_v36  ;;  %v3581_v11 = vld [vmem:[#allocation8 + $0xe8] sm:$0xff] }
 0x104   :  { %2144 = vmatpush.bf16.msrb.mxu2 %v3573_v50 }
 0x105   :  { %2157 = vmatpush.bf16.msrb.mxu3 %v3581_v11 }
 0x106   :  { %2119 = vmatpush.bf16.msrb.mxu0 %v3556_v12  ;;  %v1625_v31 = vpop.f32.mrf.mxu2 }
 0x107   :  { %2132 = vmatpush.bf16.msrb.mxu1 %v3564_v14  ;;  %v1638_v32 = vpop.f32.mrf.mxu3  ;;  %v334_v31 = vperm.slane %v3875_v47, 3 }
 0x108   :  { %2145 = vmatpush.bf16.msrb.mxu2 %v3572_v53  ;;  %v3602_v53 = vld [vmem:[%s3906_s4] ss:$0 sm:$0xff] }
 0x109   :  { %2158 = vmatpush.bf16.msrb.mxu3 %v3580_v43 }
 0x10a   :  { %2120 = vmatpush.bf16.msrb.mxu0 %v3555_v40  ;;  %v3579_v40 = vld [vmem:[#allocation8 + $0xd8] sm:$0xff] }
 0x10b   :  { %2133 = vmatpush.bf16.msrb.mxu1 %v3563_v37  ;;  %v3578_v37 = vld [vmem:[#allocation8 + $0xd0] sm:$0xff] }
 0x10c   :  { %2146 = vmatpush.bf16.msrb.mxu2 %v3571_v57 }
 0x10d   :  { %2159 = vmatpush.bf16.msrb.mxu3 %v3579_v40 }
 0x10e   :  { %2121 = vmatpush.bf16.msrb.mxu0 %v3554_v21 }
 0x10f   :  { %2134 = vmatpush.bf16.msrb.mxu1 %v3562_v63 }
 0x110   :  { %2147 = vmatpush.bf16.msrb.mxu2 %v3570_v59  ;;  %v3590_v59 = vld [vmem:[#allocation10 + $0x30] sm:$0xff] }
 0x111   :  { %2160 = vmatpush.bf16.msrb.mxu3 %v3578_v37 }
 0x112   :  { %2122 = vmatpush.bf16.msrb.mxu0 %v3553_v28  ;;  %v3576_v28 = vld [vmem:[#allocation8 + $0xc0] sm:$0xff] }
 0x113   :  { %2135 = vmatpush.bf16.msrb.mxu1 %v3561_v30 }
 0x114   :  { %2148 = vmatpush.bf16.msrb.mxu2 %v3569_v18  ;;  %v3588_v18 = vld [vmem:[#allocation10 + $0x20] sm:$0xff] }
 0x115   :  { %2161 = vmatpush.bf16.msrb.mxu3 %v3577_v24 }
 0x116   :  { %2123 = vmatpush.bf16.msrb.mxu0 %v3552_v35  ;;  %v1649_v44 = vpop.f32.mrf.mxu0 }
 0x117   :  { %2136 = vmatpush.bf16.msrb.mxu1 %v3560_v62  ;;  %v1650_v45 = vadd.f32 %v1649_v44, %v1637_v42  ;;  %v1662_v46 = vpop.f32.mrf.mxu1 }
 0x118   :  { %2149 = vmatpush.bf16.msrb.mxu2 %v3568_v1 }
 0x119   :  { %2124 = vmatmul.bf16.vlgmr.msrb.gmra.mxu0 %v1852_v39  ;;  %v1663_v48 = vadd.f32 %v1662_v46, %v1650_v45  ;;  %2162 = vmatpush.bf16.msrb.mxu3 %v3576_v28 }
 0x11b   :  { %v1849_v49 = vmax.f32 %v1663_v48, 0.0 }
 0x11d   :  { %v1853_v51 = vpack.c.bf16 %v1849_v49, %v1849_v49 }
 0x11e   :  { %v1675_v52 = vpop.f32.mrf.mxu2  ;;  %v1651_v55 = vpop.f32.mrf.mxu0 }
 0x11f   :  { %v1688_v54 = vpop.f32.mrf.mxu3  ;;  %2137 = vmatmul.bf16.vlgmr.msrb.gmra.mxu1 %v1853_v51  ;;  %v1664_v56 = vpop.f32.mrf.mxu1  ;;  %v1676_v6 = vadd.f32 %v1675_v52, %v333_v2  ;;  %v3585_v2 = vld [vmem:[#allocation10 + $0x8] sm:$0xff] }
 0x121   :  { %v1689_v34 = vadd.f32 %v1688_v54, %v1676_v6 }
 0x126   :  { %v1677_v22 = vpop.f32.mrf.mxu2 }
 0x127   :  { %v1690_v60 = vpop.f32.mrf.mxu3  ;;  %v3591_v22 = vld [vmem:[#allocation10 + $0x38] sm:$0xff] }
 0x128   :  { %2238 = vmatpush.bf16.msra.mxu0 %v3591_v22  ;;  %v3589_v60 = vld [vmem:[#allocation10 + $0x28] sm:$0xff] }
 0x12c   :  { %2239 = vmatpush.bf16.msra.mxu0 %v3590_v59 }
 0x130   :  { %2240 = vmatpush.bf16.msra.mxu0 %v3589_v60 }
 0x134   :  { %2241 = vmatpush.bf16.msra.mxu0 %v3588_v18 }
 0x136   :  { %v1701_v19 = vpop.f32.mrf.mxu0 }
 0x137   :  { %v1714_v0 = vpop.f32.mrf.mxu1  ;;  %v1702_v13 = vadd.f32 %v1701_v19, %v1689_v34  ;;  %v3587_v19 = vld [vmem:[#allocation10 + $0x18] sm:$0xff] }
 0x138   :  { %2242 = vmatpush.bf16.msra.mxu0 %v3587_v19 }
 0x139   :  { %v1715_v20 = vadd.f32 %v1714_v0, %v1702_v13  ;;  %v3586_v0 = vld [vmem:[#allocation10 + $0x10] sm:$0xff] }
 0x13c   :  { %2243 = vmatpush.bf16.msra.mxu0 %v3586_v0 }
 0x13e   :  { %v1727_v3 = vpop.f32.mrf.mxu2  ;;  %v1703_v7 = vpop.f32.mrf.mxu0 }
 0x13f   :  { %v1740_v4 = vpop.f32.mrf.mxu3  ;;  %v1716_v8 = vpop.f32.mrf.mxu1  ;;  %v1728_v14 = vadd.f32 %v1727_v3, %v1715_v20 }
 0x140   :  { %2244 = vmatpush.bf16.msra.mxu0 %v3585_v2 }
 0x141   :  { %v1741_v41 = vadd.f32 %v1740_v4, %v1728_v14  ;;  %v3584_v4 = vld [vmem:[#allocation10] sm:$0xff] }
 0x144   :  { %2245 = vmatpush.bf16.msra.mxu0 %v3584_v4 }
 0x146   :  { %v1729_v10 = vpop.f32.mrf.mxu2 }
 0x147   :  { %v1742_v12 = vpop.f32.mrf.mxu3  ;;  %v3603_v10 = vld [vmem:[%s3908_s6] ss:$0 sm:$0xff] }
 0x156   :  { %v1753_v15 = vpop.f32.mrf.mxu0 }
 0x157   :  { %v1754_v17 = vadd.f32 %v1753_v15, %v1741_v41  ;;  %v1766_v58 = vpop.f32.mrf.mxu1 }
 0x158   :  { %v1767_v32 = vadd.f32 %v1766_v58, %v334_v31 }
 0x159   :  { %v1850_v21 = vmax.f32 %v1754_v17, 0.0 }
 0x15b   :  { %v1854_v23 = vpack.c.bf16 %v1850_v21, %v1850_v21 }
 0x15d   :  { %2150 = vmatmul.bf16.vlgmr.msrb.gmra.mxu2 %v1854_v23 }
 0x15e   :  { %v1779_v25 = vpop.f32.mrf.mxu2  ;;  %v1755_v26 = vpop.f32.mrf.mxu0 }
 0x15f   :  { %v1792_v63 = vpop.f32.mrf.mxu3  ;;  %v1768_v29 = vpop.f32.mrf.mxu1  ;;  %v1780_v33 = vadd.f32 %v1779_v25, %v1767_v32 }
 0x161   :  { %v1793_v35 = vadd.f32 %v1792_v63, %v1780_v33 }
 0x166   :  { %v1781_v61 = vpop.f32.mrf.mxu2 }
 0x167   :  { %v1794_v30 = vpop.f32.mrf.mxu3 }
 0x176   :  { %v1805_v36 = vpop.f32.mrf.mxu0 }
 0x177   :  { %v1818_v62 = vpop.f32.mrf.mxu1  ;;  %v1806_v38 = vadd.f32 %v1805_v36, %v1793_v35 }
 0x179   :  { %v1819_v39 = vadd.f32 %v1818_v62, %v1806_v38 }
 0x17e   :  { %v1831_v27 = vpop.f32.mrf.mxu2  ;;  %v1807_v16 = vpop.f32.mrf.mxu0 }
 0x17f   :  { %v1832_v42 = vadd.f32 %v1831_v27, %v1819_v39  ;;  %v1844_v44 = vpop.f32.mrf.mxu3  ;;  %v1820_v45 = vpop.f32.mrf.mxu1 }
 0x181   :  { %v1845_v46 = vadd.f32 %v1844_v44, %v1832_v42 }
 0x183   :  { %v1851_v48 = vmax.f32 %v1845_v46, 0.0 }
 0x185   :  { %v1855_v49 = vpack.c.bf16 %v1851_v48, %v1851_v48 }
 0x186   :  { %v1833_v50 = vpop.f32.mrf.mxu2 }
 0x187   :  { %v1846_v51 = vpop.f32.mrf.mxu3  ;;  %2163 = vmatmul.bf16.vlgmr.msrb.gmra.mxu3 %v1855_v49 }
 0x196   :  { %v2125_v52 = vpop.f32.mrf.mxu0 }
 0x197   :  { %v2126_v54 = vadd.f32 %v3602_v53, %v2125_v52 }
 0x19c   :  { %v2138_v55 = vpop.f32.mrf.mxu1 }
 0x19d   :  { %v2139_v56 = vadd.f32 %v2138_v55, %v2126_v54 }
 0x19e   :  { %v2127_v47 = vpop.f32.mrf.mxu0 }
 0x1a4   :  { %v2140_v57 = vpop.f32.mrf.mxu1 }
 0x1e0   :  { %v2151_v1 = vpop.f32.mrf.mxu2 }
 0x1e1   :  { %v2152_v5 = vadd.f32 %v2151_v1, %v2139_v56 }
 0x1e8   :  { %v2153_v3 = vpop.f32.mrf.mxu2 }
 0x20a   :  { %v2164_v6 = vpop.f32.mrf.mxu3 }
 0x20b   :  { %v2165_v7 = vadd.f32 %v2164_v6, %v2152_v5 }
 0x20d   :  { %v2168_v8 = vmax.f32 %v2165_v7, 0.0 }
 0x20f   :  { %v2169_v9 = vpack.c.bf16 %v2168_v8, %v2168_v8 }
 0x211   :  { %2246 = vmatmul.bf16.vlgmr.msra.gmra.mxu0 %v2169_v9 }
 0x212   :  { %v2166_v34 = vpop.f32.mrf.mxu3 }
 0x28e   :  { %v2247_v11 = vpop.f32.mrf.mxu0 }
 0x28f   :  { %v2248_v12 = vadd.f32 %v3603_v10, %v2247_v11 }
 0x291   :  { %v2251_v13 = vmax.f32 %v2248_v12, 0.0 }
 0x293   :  { %2252 = vst [vmem:[#allocation11] sm:$0xff] %v2251_v13 }
 0x294   :  { %2263 = dma.vmem_to_hbm [thread:$0]  %s2259_s29, 128, %s2261_s9, [#allocation4]  }
 0x296   :  { %v2249_v43 = vpop.f32.mrf.mxu0 }
 0x297   :  { %3754 = dma.done.wait [#allocation4], 128  }
 0x298   :  { %3755 = vsyncadd [#allocation4], 4294967168 }
 0x299   :  { %2268 = vsyncpa [#allocation3], 1 }
 0x29a   :  { %2269 = vsyncpa [#allocation6], 1 }
 0x29b   :  { %2270 = vsyncpa [#allocation9], 1 }
 0x29c   :  { %2271 = vsyncpa [#allocation4], 1 }

</bundles_post_ra>
